<compile_context>
chip_gen: v6e
topology: v6e:2x2x1
jax: 0.10.0
libtpu: 0.0.40
codegen_flags: <defaults>
</compile_context>

<pallas_src>
import functools

import numpy as np
import jax
import jax.numpy as jnp
from jax import lax
from jax.experimental import pallas as pl
from jax.experimental.pallas import tpu as pltpu

KD = 5            # GhostConv.cv2 depthwise kernel size
PAD = KD // 2     # autopad(5) = 2


def _silu(x):
    return x * jax.nn.sigmoid(x)


def _shift_lanes(x, off):
    """shifted[..., p] = x[..., (p + off) mod L] for a static offset."""
    l = x.shape[-1]
    k = off % l
    if k == 0:
        return x
    return jnp.concatenate([x[..., k:], x[..., :k]], axis=-1)


def _ghost_conv_kernel(x_ref, w1_ref, s1_ref, b1_ref, dw_ref, m_ref,
                       s2_ref, b2_ref, o_ref, *, width):
    c_in = w1_ref.shape[1]                 # C1
    c_ = w1_ref.shape[0]                   # C2 // 2
    hw = x_ref.shape[2]                    # H * W  (lane dim)

    x = x_ref[0].astype(jnp.float32)       # (C1, H*W)

    # ---- cv1: 1x1 conv + folded BN + SiLU (exact f32 VPU FMAs) ----
    y = jnp.zeros((c_, hw), jnp.float32)
    for i in range(c_in):                                    # static unroll
        y = y + w1_ref[:, i:i + 1] * x[i:i + 1, :]           # (c_,1)*(1,HW)
    y = _silu(y * s1_ref[...] + b1_ref[...])                 # (c_, HW)

    # ---- cv2: depthwise 5x5, pad 2 -> 25 masked lane-shift FMAs ----
    acc = jnp.zeros((c_, hw), jnp.float32)
    for di in range(KD):
        for dj in range(KD):
            tap = di * KD + dj
            off = (di - PAD) * width + (dj - PAD)
            shifted = _shift_lanes(y, off)                   # (c_, HW)
            masked = m_ref[tap:tap + 1, :] * shifted         # zero the halo
            acc = acc + dw_ref[:, tap:tap + 1] * masked      # per-chan weight
    z = _silu(acc * s2_ref[...] + b2_ref[...])               # (c_, HW)

    # ---- concat([y, z], channel): one lane-dense (256-lane) store ----
    o_ref[0] = jnp.concatenate([y, z], axis=0).astype(o_ref.dtype)


def _halo_masks(h, w):
    """(KD*KD, H*W) float32: 1 where the tap reads inside the image, else 0."""
    s = (np.arange(KD) - PAD)[:, None, None]
    t = (np.arange(KD) - PAD)[None, :, None]
    ii = (np.arange(h * w) // w)[None, None, :]
    jj = (np.arange(h * w) % w)[None, None, :]
    valid = (ii + s >= 0) & (ii + s < h) & (jj + t >= 0) & (jj + t < w)
    return valid.reshape(KD * KD, h * w).astype(np.float32)


def _full_spec(a):
    zeros = (0,) * a.ndim
    return pl.BlockSpec(a.shape, lambda n, _z=zeros: _z)


@jax.jit
def ghost_conv(x_nchw, p):
    """x_nchw: (N, C1, H, W) float32, PyTorch layout.  Returns (N, C2, H, W)."""
    n, c1, h, w = x_nchw.shape
    c_ = p["w1"].shape[0]
    c2 = 2 * c_
    hw = h * w

    xf = x_nchw.reshape(n, c1, hw)              # free relabel of NCHW memory
    masks = jnp.asarray(_halo_masks(h, w))      # compile-time constant
    dwk = p["dw"].reshape(c_, KD * KD)          # (c_, 25) tap weights

    kernel = functools.partial(_ghost_conv_kernel, width=w)
    args = (xf, p["w1"], p["s1"], p["b1"], dwk, masks, p["s2"], p["b2"])
    out = pl.pallas_call(
        kernel,
        out_shape=jax.ShapeDtypeStruct((n, c2, hw), x_nchw.dtype),
        grid=(n,),
        in_specs=[pl.BlockSpec((1, c1, hw), lambda i: (i, 0, 0))]
                 + [_full_spec(a) for a in args[1:]],
        out_specs=pl.BlockSpec((1, c2, hw), lambda i: (i, 0, 0)),
        compiler_params=pltpu.CompilerParams(
            dimension_semantics=("parallel",)),   # megacore on v7x
    )(*args)
    return out.reshape(n, c2, h, w)


# ---------------- deterministic synthetic parameters (eval-mode BN folded) ----
def _folded_bn(key, c):
    kg, kb, km, kv = jax.random.split(key, 4)
    gamma = 1.0 + 0.1 * jax.random.normal(kg, (c,), jnp.float32)
    beta = 0.1 * jax.random.normal(kb, (c,), jnp.float32)
    mean = 0.1 * jax.random.normal(km, (c,), jnp.float32)
    var = jax.nn.softplus(jax.random.normal(kv, (c,), jnp.float32)) + 0.5
    s = gamma / jnp.sqrt(var + 1e-5)
    b = beta - mean * s
    return s.reshape(c, 1), b.reshape(c, 1)


def make_params(key, c1, c2):
    assert c2 % 2 == 0
    c_ = c2 // 2
    ks = jax.random.split(key, 4)
    w1 = 0.3 * jax.random.normal(ks[0], (c_, c1), jnp.float32)    # (out, in)
    s1, b1 = _folded_bn(ks[1], c_)
    dw = 0.3 * jax.random.normal(ks[2], (c_, KD, KD), jnp.float32)
    s2, b2 = _folded_bn(ks[3], c_)
    return dict(w1=w1, s1=s1, b1=b1, dw=dw, s2=s2, b2=b2)


# ---------------- independent pure-JAX reference ----------------
def ghost_conv_ref(x, p):
    c_ = p["w1"].shape[0]
    w1 = p["w1"][:, :, None, None]                       # OIHW (c_, C1, 1, 1)
    dw = p["dw"][:, None, :, :]                          # (c_, 1, 5, 5)
    y = lax.conv_general_dilated(
        x, w1, (1, 1), "VALID",
        dimension_numbers=("NCHW", "OIHW", "NCHW"),
        precision=lax.Precision.HIGHEST)
    y = jax.nn.silu(y * p["s1"].reshape(1, c_, 1, 1) + p["b1"].reshape(1, c_, 1, 1))
    z = lax.conv_general_dilated(
        y, dw, (1, 1), [(PAD, PAD), (PAD, PAD)],
        dimension_numbers=("NCHW", "OIHW", "NCHW"),
        feature_group_count=c_,
        precision=lax.Precision.HIGHEST)
    z = jax.nn.silu(z * p["s2"].reshape(1, c_, 1, 1) + p["b2"].reshape(1, c_, 1, 1))
    return jnp.concatenate([y, z], axis=1)


if __name__ == "__main__":
    key = jax.random.PRNGKey(0)
    kx, kp = jax.random.split(key)
    N, C1, C2, H, W = 2, 8, 16, 16, 16
    x = jax.random.normal(kx, (N, C1, H, W), jnp.float32)
    params = make_params(kp, C1, C2)

    out = jax.block_until_ready(ghost_conv(x, params))
    ref = ghost_conv_ref(x, params)

    assert out.shape == (N, C2, H, W)
    assert jnp.allclose(out, ref, atol=1e-2, rtol=1e-2), \
        float(jnp.max(jnp.abs(out - ref)))
    print("KERNEL_OK")
</pallas_src>

<mosaic_0001>
module attributes {stable_mosaic.version = 11 : i64} {
  func.func @_ghost_conv_kernel(%arg0: i32, %arg1: memref<1x8x256xf32, #tpu.memory_space<vmem>>, %arg2: memref<8x8xf32, #tpu.memory_space<vmem>>, %arg3: memref<8x1xf32, #tpu.memory_space<vmem>>, %arg4: memref<8x1xf32, #tpu.memory_space<vmem>>, %arg5: memref<8x25xf32, #tpu.memory_space<vmem>>, %arg6: memref<25x256xf32, #tpu.memory_space<vmem>>, %arg7: memref<8x1xf32, #tpu.memory_space<vmem>>, %arg8: memref<8x1xf32, #tpu.memory_space<vmem>>, %arg9: memref<1x16x256xf32, #tpu.memory_space<vmem>>) attributes {dimension_semantics = [#tpu.dimension_semantics<parallel>], iteration_bounds = array<i64: 2>, scalar_prefetch = 0 : i64, scratch_operands = 0 : i64, tpu.core_type = #tpu.core_type<tc>, window_params = [{transform_indices = @transform_0, window_bounds = array<i64: 1, 8, 256>}, {pipeline_mode = #tpu.pipeline_mode<synchronous>, transform_indices = @transform_1, window_bounds = array<i64: 8, 8>}, {pipeline_mode = #tpu.pipeline_mode<synchronous>, transform_indices = @transform_2, window_bounds = array<i64: 8, 1>}, {pipeline_mode = #tpu.pipeline_mode<synchronous>, transform_indices = @transform_3, window_bounds = array<i64: 8, 1>}, {pipeline_mode = #tpu.pipeline_mode<synchronous>, transform_indices = @transform_4, window_bounds = array<i64: 8, 25>}, {pipeline_mode = #tpu.pipeline_mode<synchronous>, transform_indices = @transform_5, window_bounds = array<i64: 25, 256>}, {pipeline_mode = #tpu.pipeline_mode<synchronous>, transform_indices = @transform_6, window_bounds = array<i64: 8, 1>}, {pipeline_mode = #tpu.pipeline_mode<synchronous>, transform_indices = @transform_7, window_bounds = array<i64: 8, 1>}, {transform_indices = @transform_8, window_bounds = array<i64: 1, 16, 256>}]} {
    %c0 = arith.constant 0 : index
    %c0_0 = arith.constant 0 : index
    %c0_1 = arith.constant 0 : index
    %0 = vector.load %arg1[%c0, %c0_0, %c0_1] : memref<1x8x256xf32, #tpu.memory_space<vmem>>, vector<1x8x256xf32>
    %1 = vector.shape_cast %0 : vector<1x8x256xf32> to vector<8x256xf32>
    %cst = arith.constant 0.000000e+00 : f32
    %2 = vector.broadcast %cst : f32 to vector<8x256xf32>
    %c0_2 = arith.constant 0 : index
    %c0_3 = arith.constant 0 : index
    %3 = vector.load %arg2[%c0_2, %c0_3] : memref<8x8xf32, #tpu.memory_space<vmem>>, vector<8x1xf32>
    %4 = vector.extract_strided_slice %1 {offsets = [0, 0], sizes = [1, 256], strides = [1, 1]} : vector<8x256xf32> to vector<1x256xf32>
    %5 = vector.broadcast %3 : vector<8x1xf32> to vector<8x256xf32>
    %6 = vector.broadcast %4 : vector<1x256xf32> to vector<8x256xf32>
    %7 = arith.mulf %5, %6 : vector<8x256xf32>
    %8 = arith.addf %2, %7 : vector<8x256xf32>
    %c0_4 = arith.constant 0 : index
    %c1 = arith.constant 1 : index
    %9 = vector.load %arg2[%c0_4, %c1] : memref<8x8xf32, #tpu.memory_space<vmem>>, vector<8x1xf32>
    %10 = vector.extract_strided_slice %1 {offsets = [1, 0], sizes = [1, 256], strides = [1, 1]} : vector<8x256xf32> to vector<1x256xf32>
    %11 = vector.broadcast %9 : vector<8x1xf32> to vector<8x256xf32>
    %12 = vector.broadcast %10 : vector<1x256xf32> to vector<8x256xf32>
    %13 = arith.mulf %11, %12 : vector<8x256xf32>
    %14 = arith.addf %8, %13 : vector<8x256xf32>
    %c0_5 = arith.constant 0 : index
    %c2 = arith.constant 2 : index
    %15 = vector.load %arg2[%c0_5, %c2] : memref<8x8xf32, #tpu.memory_space<vmem>>, vector<8x1xf32>
    %16 = vector.extract_strided_slice %1 {offsets = [2, 0], sizes = [1, 256], strides = [1, 1]} : vector<8x256xf32> to vector<1x256xf32>
    %17 = vector.broadcast %15 : vector<8x1xf32> to vector<8x256xf32>
    %18 = vector.broadcast %16 : vector<1x256xf32> to vector<8x256xf32>
    %19 = arith.mulf %17, %18 : vector<8x256xf32>
    %20 = arith.addf %14, %19 : vector<8x256xf32>
    %c0_6 = arith.constant 0 : index
    %c3 = arith.constant 3 : index
    %21 = vector.load %arg2[%c0_6, %c3] : memref<8x8xf32, #tpu.memory_space<vmem>>, vector<8x1xf32>
    %22 = vector.extract_strided_slice %1 {offsets = [3, 0], sizes = [1, 256], strides = [1, 1]} : vector<8x256xf32> to vector<1x256xf32>
    %23 = vector.broadcast %21 : vector<8x1xf32> to vector<8x256xf32>
    %24 = vector.broadcast %22 : vector<1x256xf32> to vector<8x256xf32>
    %25 = arith.mulf %23, %24 : vector<8x256xf32>
    %26 = arith.addf %20, %25 : vector<8x256xf32>
    %c0_7 = arith.constant 0 : index
    %c4 = arith.constant 4 : index
    %27 = vector.load %arg2[%c0_7, %c4] : memref<8x8xf32, #tpu.memory_space<vmem>>, vector<8x1xf32>
    %28 = vector.extract_strided_slice %1 {offsets = [4, 0], sizes = [1, 256], strides = [1, 1]} : vector<8x256xf32> to vector<1x256xf32>
    %29 = vector.broadcast %27 : vector<8x1xf32> to vector<8x256xf32>
    %30 = vector.broadcast %28 : vector<1x256xf32> to vector<8x256xf32>
    %31 = arith.mulf %29, %30 : vector<8x256xf32>
    %32 = arith.addf %26, %31 : vector<8x256xf32>
    %c0_8 = arith.constant 0 : index
    %c5 = arith.constant 5 : index
    %33 = vector.load %arg2[%c0_8, %c5] : memref<8x8xf32, #tpu.memory_space<vmem>>, vector<8x1xf32>
    %34 = vector.extract_strided_slice %1 {offsets = [5, 0], sizes = [1, 256], strides = [1, 1]} : vector<8x256xf32> to vector<1x256xf32>
    %35 = vector.broadcast %33 : vector<8x1xf32> to vector<8x256xf32>
    %36 = vector.broadcast %34 : vector<1x256xf32> to vector<8x256xf32>
    %37 = arith.mulf %35, %36 : vector<8x256xf32>
    %38 = arith.addf %32, %37 : vector<8x256xf32>
    %c0_9 = arith.constant 0 : index
    %c6 = arith.constant 6 : index
    %39 = vector.load %arg2[%c0_9, %c6] : memref<8x8xf32, #tpu.memory_space<vmem>>, vector<8x1xf32>
    %40 = vector.extract_strided_slice %1 {offsets = [6, 0], sizes = [1, 256], strides = [1, 1]} : vector<8x256xf32> to vector<1x256xf32>
    %41 = vector.broadcast %39 : vector<8x1xf32> to vector<8x256xf32>
    %42 = vector.broadcast %40 : vector<1x256xf32> to vector<8x256xf32>
    %43 = arith.mulf %41, %42 : vector<8x256xf32>
    %44 = arith.addf %38, %43 : vector<8x256xf32>
    %c0_10 = arith.constant 0 : index
    %c7 = arith.constant 7 : index
    %45 = vector.load %arg2[%c0_10, %c7] : memref<8x8xf32, #tpu.memory_space<vmem>>, vector<8x1xf32>
    %46 = vector.extract_strided_slice %1 {offsets = [7, 0], sizes = [1, 256], strides = [1, 1]} : vector<8x256xf32> to vector<1x256xf32>
    %47 = vector.broadcast %45 : vector<8x1xf32> to vector<8x256xf32>
    %48 = vector.broadcast %46 : vector<1x256xf32> to vector<8x256xf32>
    %49 = arith.mulf %47, %48 : vector<8x256xf32>
    %50 = arith.addf %44, %49 : vector<8x256xf32>
    %c0_11 = arith.constant 0 : index
    %c0_12 = arith.constant 0 : index
    %51 = vector.load %arg3[%c0_11, %c0_12] : memref<8x1xf32, #tpu.memory_space<vmem>>, vector<8x1xf32>
    %52 = vector.broadcast %51 : vector<8x1xf32> to vector<8x256xf32>
    %53 = arith.mulf %50, %52 : vector<8x256xf32>
    %c0_13 = arith.constant 0 : index
    %c0_14 = arith.constant 0 : index
    %54 = vector.load %arg4[%c0_13, %c0_14] : memref<8x1xf32, #tpu.memory_space<vmem>>, vector<8x1xf32>
    %55 = vector.broadcast %54 : vector<8x1xf32> to vector<8x256xf32>
    %56 = arith.addf %53, %55 : vector<8x256xf32>
    %57 = arith.negf %56 : vector<8x256xf32>
    %58 = math.exp %57 : vector<8x256xf32>
    %cst_15 = arith.constant 1.000000e+00 : f32
    %59 = vector.broadcast %cst_15 : f32 to vector<8x256xf32>
    %60 = arith.addf %59, %58 : vector<8x256xf32>
    %61 = arith.divf %59, %60 : vector<8x256xf32>
    %62 = arith.mulf %56, %61 : vector<8x256xf32>
    %cst_16 = arith.constant 0.000000e+00 : f32
    %63 = vector.broadcast %cst_16 : f32 to vector<8x256xf32>
    %64 = vector.extract_strided_slice %62 {offsets = [0, 222], sizes = [8, 34], strides = [1, 1]} : vector<8x256xf32> to vector<8x34xf32>
    %65 = vector.extract_strided_slice %62 {offsets = [0, 0], sizes = [8, 222], strides = [1, 1]} : vector<8x256xf32> to vector<8x222xf32>
    %66 = tpu.concatenate %64, %65 in 1 : vector<8x34xf32>, vector<8x222xf32> -> vector<8x256xf32>
    %c0_17 = arith.constant 0 : index
    %c0_18 = arith.constant 0 : index
    %67 = vector.load %arg6[%c0_17, %c0_18] : memref<25x256xf32, #tpu.memory_space<vmem>>, vector<1x256xf32>
    %68 = vector.broadcast %67 : vector<1x256xf32> to vector<8x256xf32>
    %69 = arith.mulf %68, %66 : vector<8x256xf32>
    %c0_19 = arith.constant 0 : index
    %c0_20 = arith.constant 0 : index
    %70 = vector.load %arg5[%c0_19, %c0_20] : memref<8x25xf32, #tpu.memory_space<vmem>>, vector<8x1xf32>
    %71 = vector.broadcast %70 : vector<8x1xf32> to vector<8x256xf32>
    %72 = arith.mulf %71, %69 : vector<8x256xf32>
    %73 = arith.addf %63, %72 : vector<8x256xf32>
    %74 = vector.extract_strided_slice %62 {offsets = [0, 223], sizes = [8, 33], strides = [1, 1]} : vector<8x256xf32> to vector<8x33xf32>
    %75 = vector.extract_strided_slice %62 {offsets = [0, 0], sizes = [8, 223], strides = [1, 1]} : vector<8x256xf32> to vector<8x223xf32>
    %76 = tpu.concatenate %74, %75 in 1 : vector<8x33xf32>, vector<8x223xf32> -> vector<8x256xf32>
    %c1_21 = arith.constant 1 : index
    %c0_22 = arith.constant 0 : index
    %77 = vector.load %arg6[%c1_21, %c0_22] : memref<25x256xf32, #tpu.memory_space<vmem>>, vector<1x256xf32>
    %78 = vector.broadcast %77 : vector<1x256xf32> to vector<8x256xf32>
    %79 = arith.mulf %78, %76 : vector<8x256xf32>
    %c0_23 = arith.constant 0 : index
    %c1_24 = arith.constant 1 : index
    %80 = vector.load %arg5[%c0_23, %c1_24] : memref<8x25xf32, #tpu.memory_space<vmem>>, vector<8x1xf32>
    %81 = vector.broadcast %80 : vector<8x1xf32> to vector<8x256xf32>
    %82 = arith.mulf %81, %79 : vector<8x256xf32>
    %83 = arith.addf %73, %82 : vector<8x256xf32>
    %84 = vector.extract_strided_slice %62 {offsets = [0, 224], sizes = [8, 32], strides = [1, 1]} : vector<8x256xf32> to vector<8x32xf32>
    %85 = vector.extract_strided_slice %62 {offsets = [0, 0], sizes = [8, 224], strides = [1, 1]} : vector<8x256xf32> to vector<8x224xf32>
    %86 = tpu.concatenate %84, %85 in 1 : vector<8x32xf32>, vector<8x224xf32> -> vector<8x256xf32>
    %c2_25 = arith.constant 2 : index
    %c0_26 = arith.constant 0 : index
    %87 = vector.load %arg6[%c2_25, %c0_26] : memref<25x256xf32, #tpu.memory_space<vmem>>, vector<1x256xf32>
    %88 = vector.broadcast %87 : vector<1x256xf32> to vector<8x256xf32>
    %89 = arith.mulf %88, %86 : vector<8x256xf32>
    %c0_27 = arith.constant 0 : index
    %c2_28 = arith.constant 2 : index
    %90 = vector.load %arg5[%c0_27, %c2_28] : memref<8x25xf32, #tpu.memory_space<vmem>>, vector<8x1xf32>
    %91 = vector.broadcast %90 : vector<8x1xf32> to vector<8x256xf32>
    %92 = arith.mulf %91, %89 : vector<8x256xf32>
    %93 = arith.addf %83, %92 : vector<8x256xf32>
    %94 = vector.extract_strided_slice %62 {offsets = [0, 225], sizes = [8, 31], strides = [1, 1]} : vector<8x256xf32> to vector<8x31xf32>
    %95 = vector.extract_strided_slice %62 {offsets = [0, 0], sizes = [8, 225], strides = [1, 1]} : vector<8x256xf32> to vector<8x225xf32>
    %96 = tpu.concatenate %94, %95 in 1 : vector<8x31xf32>, vector<8x225xf32> -> vector<8x256xf32>
    %c3_29 = arith.constant 3 : index
    %c0_30 = arith.constant 0 : index
    %97 = vector.load %arg6[%c3_29, %c0_30] : memref<25x256xf32, #tpu.memory_space<vmem>>, vector<1x256xf32>
    %98 = vector.broadcast %97 : vector<1x256xf32> to vector<8x256xf32>
    %99 = arith.mulf %98, %96 : vector<8x256xf32>
    %c0_31 = arith.constant 0 : index
    %c3_32 = arith.constant 3 : index
    %100 = vector.load %arg5[%c0_31, %c3_32] : memref<8x25xf32, #tpu.memory_space<vmem>>, vector<8x1xf32>
    %101 = vector.broadcast %100 : vector<8x1xf32> to vector<8x256xf32>
    %102 = arith.mulf %101, %99 : vector<8x256xf32>
    %103 = arith.addf %93, %102 : vector<8x256xf32>
    %104 = vector.extract_strided_slice %62 {offsets = [0, 226], sizes = [8, 30], strides = [1, 1]} : vector<8x256xf32> to vector<8x30xf32>
    %105 = vector.extract_strided_slice %62 {offsets = [0, 0], sizes = [8, 226], strides = [1, 1]} : vector<8x256xf32> to vector<8x226xf32>
    %106 = tpu.concatenate %104, %105 in 1 : vector<8x30xf32>, vector<8x226xf32> -> vector<8x256xf32>
    %c4_33 = arith.constant 4 : index
    %c0_34 = arith.constant 0 : index
    %107 = vector.load %arg6[%c4_33, %c0_34] : memref<25x256xf32, #tpu.memory_space<vmem>>, vector<1x256xf32>
    %108 = vector.broadcast %107 : vector<1x256xf32> to vector<8x256xf32>
    %109 = arith.mulf %108, %106 : vector<8x256xf32>
    %c0_35 = arith.constant 0 : index
    %c4_36 = arith.constant 4 : index
    %110 = vector.load %arg5[%c0_35, %c4_36] : memref<8x25xf32, #tpu.memory_space<vmem>>, vector<8x1xf32>
    %111 = vector.broadcast %110 : vector<8x1xf32> to vector<8x256xf32>
    %112 = arith.mulf %111, %109 : vector<8x256xf32>
    %113 = arith.addf %103, %112 : vector<8x256xf32>
    %114 = vector.extract_strided_slice %62 {offsets = [0, 238], sizes = [8, 18], strides = [1, 1]} : vector<8x256xf32> to vector<8x18xf32>
    %115 = vector.extract_strided_slice %62 {offsets = [0, 0], sizes = [8, 238], strides = [1, 1]} : vector<8x256xf32> to vector<8x238xf32>
    %116 = tpu.concatenate %114, %115 in 1 : vector<8x18xf32>, vector<8x238xf32> -> vector<8x256xf32>
    %c5_37 = arith.constant 5 : index
    %c0_38 = arith.constant 0 : index
    %117 = vector.load %arg6[%c5_37, %c0_38] : memref<25x256xf32, #tpu.memory_space<vmem>>, vector<1x256xf32>
    %118 = vector.broadcast %117 : vector<1x256xf32> to vector<8x256xf32>
    %119 = arith.mulf %118, %116 : vector<8x256xf32>
    %c0_39 = arith.constant 0 : index
    %c5_40 = arith.constant 5 : index
    %120 = vector.load %arg5[%c0_39, %c5_40] : memref<8x25xf32, #tpu.memory_space<vmem>>, vector<8x1xf32>
    %121 = vector.broadcast %120 : vector<8x1xf32> to vector<8x256xf32>
    %122 = arith.mulf %121, %119 : vector<8x256xf32>
    %123 = arith.addf %113, %122 : vector<8x256xf32>
    %124 = vector.extract_strided_slice %62 {offsets = [0, 239], sizes = [8, 17], strides = [1, 1]} : vector<8x256xf32> to vector<8x17xf32>
    %125 = vector.extract_strided_slice %62 {offsets = [0, 0], sizes = [8, 239], strides = [1, 1]} : vector<8x256xf32> to vector<8x239xf32>
    %126 = tpu.concatenate %124, %125 in 1 : vector<8x17xf32>, vector<8x239xf32> -> vector<8x256xf32>
    %c6_41 = arith.constant 6 : index
    %c0_42 = arith.constant 0 : index
    %127 = vector.load %arg6[%c6_41, %c0_42] : memref<25x256xf32, #tpu.memory_space<vmem>>, vector<1x256xf32>
    %128 = vector.broadcast %127 : vector<1x256xf32> to vector<8x256xf32>
    %129 = arith.mulf %128, %126 : vector<8x256xf32>
    %c0_43 = arith.constant 0 : index
    %c6_44 = arith.constant 6 : index
    %130 = vector.load %arg5[%c0_43, %c6_44] : memref<8x25xf32, #tpu.memory_space<vmem>>, vector<8x1xf32>
    %131 = vector.broadcast %130 : vector<8x1xf32> to vector<8x256xf32>
    %132 = arith.mulf %131, %129 : vector<8x256xf32>
    %133 = arith.addf %123, %132 : vector<8x256xf32>
    %134 = vector.extract_strided_slice %62 {offsets = [0, 240], sizes = [8, 16], strides = [1, 1]} : vector<8x256xf32> to vector<8x16xf32>
    %135 = vector.extract_strided_slice %62 {offsets = [0, 0], sizes = [8, 240], strides = [1, 1]} : vector<8x256xf32> to vector<8x240xf32>
    %136 = tpu.concatenate %134, %135 in 1 : vector<8x16xf32>, vector<8x240xf32> -> vector<8x256xf32>
    %c7_45 = arith.constant 7 : index
    %c0_46 = arith.constant 0 : index
    %137 = vector.load %arg6[%c7_45, %c0_46] : memref<25x256xf32, #tpu.memory_space<vmem>>, vector<1x256xf32>
    %138 = vector.broadcast %137 : vector<1x256xf32> to vector<8x256xf32>
    %139 = arith.mulf %138, %136 : vector<8x256xf32>
    %c0_47 = arith.constant 0 : index
    %c7_48 = arith.constant 7 : index
    %140 = vector.load %arg5[%c0_47, %c7_48] : memref<8x25xf32, #tpu.memory_space<vmem>>, vector<8x1xf32>
    %141 = vector.broadcast %140 : vector<8x1xf32> to vector<8x256xf32>
    %142 = arith.mulf %141, %139 : vector<8x256xf32>
    %143 = arith.addf %133, %142 : vector<8x256xf32>
    %144 = vector.extract_strided_slice %62 {offsets = [0, 241], sizes = [8, 15], strides = [1, 1]} : vector<8x256xf32> to vector<8x15xf32>
    %145 = vector.extract_strided_slice %62 {offsets = [0, 0], sizes = [8, 241], strides = [1, 1]} : vector<8x256xf32> to vector<8x241xf32>
    %146 = tpu.concatenate %144, %145 in 1 : vector<8x15xf32>, vector<8x241xf32> -> vector<8x256xf32>
    %c8 = arith.constant 8 : index
    %c0_49 = arith.constant 0 : index
    %147 = vector.load %arg6[%c8, %c0_49] : memref<25x256xf32, #tpu.memory_space<vmem>>, vector<1x256xf32>
    %148 = vector.broadcast %147 : vector<1x256xf32> to vector<8x256xf32>
    %149 = arith.mulf %148, %146 : vector<8x256xf32>
    %c0_50 = arith.constant 0 : index
    %c8_51 = arith.constant 8 : index
    %150 = vector.load %arg5[%c0_50, %c8_51] : memref<8x25xf32, #tpu.memory_space<vmem>>, vector<8x1xf32>
    %151 = vector.broadcast %150 : vector<8x1xf32> to vector<8x256xf32>
    %152 = arith.mulf %151, %149 : vector<8x256xf32>
    %153 = arith.addf %143, %152 : vector<8x256xf32>
    %154 = vector.extract_strided_slice %62 {offsets = [0, 242], sizes = [8, 14], strides = [1, 1]} : vector<8x256xf32> to vector<8x14xf32>
    %155 = vector.extract_strided_slice %62 {offsets = [0, 0], sizes = [8, 242], strides = [1, 1]} : vector<8x256xf32> to vector<8x242xf32>
    %156 = tpu.concatenate %154, %155 in 1 : vector<8x14xf32>, vector<8x242xf32> -> vector<8x256xf32>
    %c9 = arith.constant 9 : index
    %c0_52 = arith.constant 0 : index
    %157 = vector.load %arg6[%c9, %c0_52] : memref<25x256xf32, #tpu.memory_space<vmem>>, vector<1x256xf32>
    %158 = vector.broadcast %157 : vector<1x256xf32> to vector<8x256xf32>
    %159 = arith.mulf %158, %156 : vector<8x256xf32>
    %c0_53 = arith.constant 0 : index
    %c9_54 = arith.constant 9 : index
    %160 = vector.load %arg5[%c0_53, %c9_54] : memref<8x25xf32, #tpu.memory_space<vmem>>, vector<8x1xf32>
    %161 = vector.broadcast %160 : vector<8x1xf32> to vector<8x256xf32>
    %162 = arith.mulf %161, %159 : vector<8x256xf32>
    %163 = arith.addf %153, %162 : vector<8x256xf32>
    %164 = vector.extract_strided_slice %62 {offsets = [0, 254], sizes = [8, 2], strides = [1, 1]} : vector<8x256xf32> to vector<8x2xf32>
    %165 = vector.extract_strided_slice %62 {offsets = [0, 0], sizes = [8, 254], strides = [1, 1]} : vector<8x256xf32> to vector<8x254xf32>
    %166 = tpu.concatenate %164, %165 in 1 : vector<8x2xf32>, vector<8x254xf32> -> vector<8x256xf32>
    %c10 = arith.constant 10 : index
    %c0_55 = arith.constant 0 : index
    %167 = vector.load %arg6[%c10, %c0_55] : memref<25x256xf32, #tpu.memory_space<vmem>>, vector<1x256xf32>
    %168 = vector.broadcast %167 : vector<1x256xf32> to vector<8x256xf32>
    %169 = arith.mulf %168, %166 : vector<8x256xf32>
    %c0_56 = arith.constant 0 : index
    %c10_57 = arith.constant 10 : index
    %170 = vector.load %arg5[%c0_56, %c10_57] : memref<8x25xf32, #tpu.memory_space<vmem>>, vector<8x1xf32>
    %171 = vector.broadcast %170 : vector<8x1xf32> to vector<8x256xf32>
    %172 = arith.mulf %171, %169 : vector<8x256xf32>
    %173 = arith.addf %163, %172 : vector<8x256xf32>
    %174 = vector.extract_strided_slice %62 {offsets = [0, 255], sizes = [8, 1], strides = [1, 1]} : vector<8x256xf32> to vector<8x1xf32>
    %175 = vector.extract_strided_slice %62 {offsets = [0, 0], sizes = [8, 255], strides = [1, 1]} : vector<8x256xf32> to vector<8x255xf32>
    %176 = tpu.concatenate %174, %175 in 1 : vector<8x1xf32>, vector<8x255xf32> -> vector<8x256xf32>
    %c11 = arith.constant 11 : index
    %c0_58 = arith.constant 0 : index
    %177 = vector.load %arg6[%c11, %c0_58] : memref<25x256xf32, #tpu.memory_space<vmem>>, vector<1x256xf32>
    %178 = vector.broadcast %177 : vector<1x256xf32> to vector<8x256xf32>
    %179 = arith.mulf %178, %176 : vector<8x256xf32>
    %c0_59 = arith.constant 0 : index
    %c11_60 = arith.constant 11 : index
    %180 = vector.load %arg5[%c0_59, %c11_60] : memref<8x25xf32, #tpu.memory_space<vmem>>, vector<8x1xf32>
    %181 = vector.broadcast %180 : vector<8x1xf32> to vector<8x256xf32>
    %182 = arith.mulf %181, %179 : vector<8x256xf32>
    %183 = arith.addf %173, %182 : vector<8x256xf32>
    %c12 = arith.constant 12 : index
    %c0_61 = arith.constant 0 : index
    %184 = vector.load %arg6[%c12, %c0_61] : memref<25x256xf32, #tpu.memory_space<vmem>>, vector<1x256xf32>
    %185 = vector.broadcast %184 : vector<1x256xf32> to vector<8x256xf32>
    %186 = arith.mulf %185, %62 : vector<8x256xf32>
    %c0_62 = arith.constant 0 : index
    %c12_63 = arith.constant 12 : index
    %187 = vector.load %arg5[%c0_62, %c12_63] : memref<8x25xf32, #tpu.memory_space<vmem>>, vector<8x1xf32>
    %188 = vector.broadcast %187 : vector<8x1xf32> to vector<8x256xf32>
    %189 = arith.mulf %188, %186 : vector<8x256xf32>
    %190 = arith.addf %183, %189 : vector<8x256xf32>
    %191 = vector.extract_strided_slice %62 {offsets = [0, 1], sizes = [8, 255], strides = [1, 1]} : vector<8x256xf32> to vector<8x255xf32>
    %192 = vector.extract_strided_slice %62 {offsets = [0, 0], sizes = [8, 1], strides = [1, 1]} : vector<8x256xf32> to vector<8x1xf32>
    %193 = tpu.concatenate %191, %192 in 1 : vector<8x255xf32>, vector<8x1xf32> -> vector<8x256xf32>
    %c13 = arith.constant 13 : index
    %c0_64 = arith.constant 0 : index
    %194 = vector.load %arg6[%c13, %c0_64] : memref<25x256xf32, #tpu.memory_space<vmem>>, vector<1x256xf32>
    %195 = vector.broadcast %194 : vector<1x256xf32> to vector<8x256xf32>
    %196 = arith.mulf %195, %193 : vector<8x256xf32>
    %c0_65 = arith.constant 0 : index
    %c13_66 = arith.constant 13 : index
    %197 = vector.load %arg5[%c0_65, %c13_66] : memref<8x25xf32, #tpu.memory_space<vmem>>, vector<8x1xf32>
    %198 = vector.broadcast %197 : vector<8x1xf32> to vector<8x256xf32>
    %199 = arith.mulf %198, %196 : vector<8x256xf32>
    %200 = arith.addf %190, %199 : vector<8x256xf32>
    %201 = vector.extract_strided_slice %62 {offsets = [0, 2], sizes = [8, 254], strides = [1, 1]} : vector<8x256xf32> to vector<8x254xf32>
    %202 = vector.extract_strided_slice %62 {offsets = [0, 0], sizes = [8, 2], strides = [1, 1]} : vector<8x256xf32> to vector<8x2xf32>
    %203 = tpu.concatenate %201, %202 in 1 : vector<8x254xf32>, vector<8x2xf32> -> vector<8x256xf32>
    %c14 = arith.constant 14 : index
    %c0_67 = arith.constant 0 : index
    %204 = vector.load %arg6[%c14, %c0_67] : memref<25x256xf32, #tpu.memory_space<vmem>>, vector<1x256xf32>
    %205 = vector.broadcast %204 : vector<1x256xf32> to vector<8x256xf32>
    %206 = arith.mulf %205, %203 : vector<8x256xf32>
    %c0_68 = arith.constant 0 : index
    %c14_69 = arith.constant 14 : index
    %207 = vector.load %arg5[%c0_68, %c14_69] : memref<8x25xf32, #tpu.memory_space<vmem>>, vector<8x1xf32>
    %208 = vector.broadcast %207 : vector<8x1xf32> to vector<8x256xf32>
    %209 = arith.mulf %208, %206 : vector<8x256xf32>
    %210 = arith.addf %200, %209 : vector<8x256xf32>
    %211 = vector.extract_strided_slice %62 {offsets = [0, 14], sizes = [8, 242], strides = [1, 1]} : vector<8x256xf32> to vector<8x242xf32>
    %212 = vector.extract_strided_slice %62 {offsets = [0, 0], sizes = [8, 14], strides = [1, 1]} : vector<8x256xf32> to vector<8x14xf32>
    %213 = tpu.concatenate %211, %212 in 1 : vector<8x242xf32>, vector<8x14xf32> -> vector<8x256xf32>
    %c15 = arith.constant 15 : index
    %c0_70 = arith.constant 0 : index
    %214 = vector.load %arg6[%c15, %c0_70] : memref<25x256xf32, #tpu.memory_space<vmem>>, vector<1x256xf32>
    %215 = vector.broadcast %214 : vector<1x256xf32> to vector<8x256xf32>
    %216 = arith.mulf %215, %213 : vector<8x256xf32>
    %c0_71 = arith.constant 0 : index
    %c15_72 = arith.constant 15 : index
    %217 = vector.load %arg5[%c0_71, %c15_72] : memref<8x25xf32, #tpu.memory_space<vmem>>, vector<8x1xf32>
    %218 = vector.broadcast %217 : vector<8x1xf32> to vector<8x256xf32>
    %219 = arith.mulf %218, %216 : vector<8x256xf32>
    %220 = arith.addf %210, %219 : vector<8x256xf32>
    %221 = vector.extract_strided_slice %62 {offsets = [0, 15], sizes = [8, 241], strides = [1, 1]} : vector<8x256xf32> to vector<8x241xf32>
    %222 = vector.extract_strided_slice %62 {offsets = [0, 0], sizes = [8, 15], strides = [1, 1]} : vector<8x256xf32> to vector<8x15xf32>
    %223 = tpu.concatenate %221, %222 in 1 : vector<8x241xf32>, vector<8x15xf32> -> vector<8x256xf32>
    %c16 = arith.constant 16 : index
    %c0_73 = arith.constant 0 : index
    %224 = vector.load %arg6[%c16, %c0_73] : memref<25x256xf32, #tpu.memory_space<vmem>>, vector<1x256xf32>
    %225 = vector.broadcast %224 : vector<1x256xf32> to vector<8x256xf32>
    %226 = arith.mulf %225, %223 : vector<8x256xf32>
    %c0_74 = arith.constant 0 : index
    %c16_75 = arith.constant 16 : index
    %227 = vector.load %arg5[%c0_74, %c16_75] : memref<8x25xf32, #tpu.memory_space<vmem>>, vector<8x1xf32>
    %228 = vector.broadcast %227 : vector<8x1xf32> to vector<8x256xf32>
    %229 = arith.mulf %228, %226 : vector<8x256xf32>
    %230 = arith.addf %220, %229 : vector<8x256xf32>
    %231 = vector.extract_strided_slice %62 {offsets = [0, 16], sizes = [8, 240], strides = [1, 1]} : vector<8x256xf32> to vector<8x240xf32>
    %232 = vector.extract_strided_slice %62 {offsets = [0, 0], sizes = [8, 16], strides = [1, 1]} : vector<8x256xf32> to vector<8x16xf32>
    %233 = tpu.concatenate %231, %232 in 1 : vector<8x240xf32>, vector<8x16xf32> -> vector<8x256xf32>
    %c17 = arith.constant 17 : index
    %c0_76 = arith.constant 0 : index
    %234 = vector.load %arg6[%c17, %c0_76] : memref<25x256xf32, #tpu.memory_space<vmem>>, vector<1x256xf32>
    %235 = vector.broadcast %234 : vector<1x256xf32> to vector<8x256xf32>
    %236 = arith.mulf %235, %233 : vector<8x256xf32>
    %c0_77 = arith.constant 0 : index
    %c17_78 = arith.constant 17 : index
    %237 = vector.load %arg5[%c0_77, %c17_78] : memref<8x25xf32, #tpu.memory_space<vmem>>, vector<8x1xf32>
    %238 = vector.broadcast %237 : vector<8x1xf32> to vector<8x256xf32>
    %239 = arith.mulf %238, %236 : vector<8x256xf32>
    %240 = arith.addf %230, %239 : vector<8x256xf32>
    %241 = vector.extract_strided_slice %62 {offsets = [0, 17], sizes = [8, 239], strides = [1, 1]} : vector<8x256xf32> to vector<8x239xf32>
    %242 = vector.extract_strided_slice %62 {offsets = [0, 0], sizes = [8, 17], strides = [1, 1]} : vector<8x256xf32> to vector<8x17xf32>
    %243 = tpu.concatenate %241, %242 in 1 : vector<8x239xf32>, vector<8x17xf32> -> vector<8x256xf32>
    %c18 = arith.constant 18 : index
    %c0_79 = arith.constant 0 : index
    %244 = vector.load %arg6[%c18, %c0_79] : memref<25x256xf32, #tpu.memory_space<vmem>>, vector<1x256xf32>
    %245 = vector.broadcast %244 : vector<1x256xf32> to vector<8x256xf32>
    %246 = arith.mulf %245, %243 : vector<8x256xf32>
    %c0_80 = arith.constant 0 : index
    %c18_81 = arith.constant 18 : index
    %247 = vector.load %arg5[%c0_80, %c18_81] : memref<8x25xf32, #tpu.memory_space<vmem>>, vector<8x1xf32>
    %248 = vector.broadcast %247 : vector<8x1xf32> to vector<8x256xf32>
    %249 = arith.mulf %248, %246 : vector<8x256xf32>
    %250 = arith.addf %240, %249 : vector<8x256xf32>
    %251 = vector.extract_strided_slice %62 {offsets = [0, 18], sizes = [8, 238], strides = [1, 1]} : vector<8x256xf32> to vector<8x238xf32>
    %252 = vector.extract_strided_slice %62 {offsets = [0, 0], sizes = [8, 18], strides = [1, 1]} : vector<8x256xf32> to vector<8x18xf32>
    %253 = tpu.concatenate %251, %252 in 1 : vector<8x238xf32>, vector<8x18xf32> -> vector<8x256xf32>
    %c19 = arith.constant 19 : index
    %c0_82 = arith.constant 0 : index
    %254 = vector.load %arg6[%c19, %c0_82] : memref<25x256xf32, #tpu.memory_space<vmem>>, vector<1x256xf32>
    %255 = vector.broadcast %254 : vector<1x256xf32> to vector<8x256xf32>
    %256 = arith.mulf %255, %253 : vector<8x256xf32>
    %c0_83 = arith.constant 0 : index
    %c19_84 = arith.constant 19 : index
    %257 = vector.load %arg5[%c0_83, %c19_84] : memref<8x25xf32, #tpu.memory_space<vmem>>, vector<8x1xf32>
    %258 = vector.broadcast %257 : vector<8x1xf32> to vector<8x256xf32>
    %259 = arith.mulf %258, %256 : vector<8x256xf32>
    %260 = arith.addf %250, %259 : vector<8x256xf32>
    %261 = vector.extract_strided_slice %62 {offsets = [0, 30], sizes = [8, 226], strides = [1, 1]} : vector<8x256xf32> to vector<8x226xf32>
    %262 = vector.extract_strided_slice %62 {offsets = [0, 0], sizes = [8, 30], strides = [1, 1]} : vector<8x256xf32> to vector<8x30xf32>
    %263 = tpu.concatenate %261, %262 in 1 : vector<8x226xf32>, vector<8x30xf32> -> vector<8x256xf32>
    %c20 = arith.constant 20 : index
    %c0_85 = arith.constant 0 : index
    %264 = vector.load %arg6[%c20, %c0_85] : memref<25x256xf32, #tpu.memory_space<vmem>>, vector<1x256xf32>
    %265 = vector.broadcast %264 : vector<1x256xf32> to vector<8x256xf32>
    %266 = arith.mulf %265, %263 : vector<8x256xf32>
    %c0_86 = arith.constant 0 : index
    %c20_87 = arith.constant 20 : index
    %267 = vector.load %arg5[%c0_86, %c20_87] : memref<8x25xf32, #tpu.memory_space<vmem>>, vector<8x1xf32>
    %268 = vector.broadcast %267 : vector<8x1xf32> to vector<8x256xf32>
    %269 = arith.mulf %268, %266 : vector<8x256xf32>
    %270 = arith.addf %260, %269 : vector<8x256xf32>
    %271 = vector.extract_strided_slice %62 {offsets = [0, 31], sizes = [8, 225], strides = [1, 1]} : vector<8x256xf32> to vector<8x225xf32>
    %272 = vector.extract_strided_slice %62 {offsets = [0, 0], sizes = [8, 31], strides = [1, 1]} : vector<8x256xf32> to vector<8x31xf32>
    %273 = tpu.concatenate %271, %272 in 1 : vector<8x225xf32>, vector<8x31xf32> -> vector<8x256xf32>
    %c21 = arith.constant 21 : index
    %c0_88 = arith.constant 0 : index
    %274 = vector.load %arg6[%c21, %c0_88] : memref<25x256xf32, #tpu.memory_space<vmem>>, vector<1x256xf32>
    %275 = vector.broadcast %274 : vector<1x256xf32> to vector<8x256xf32>
    %276 = arith.mulf %275, %273 : vector<8x256xf32>
    %c0_89 = arith.constant 0 : index
    %c21_90 = arith.constant 21 : index
    %277 = vector.load %arg5[%c0_89, %c21_90] : memref<8x25xf32, #tpu.memory_space<vmem>>, vector<8x1xf32>
    %278 = vector.broadcast %277 : vector<8x1xf32> to vector<8x256xf32>
    %279 = arith.mulf %278, %276 : vector<8x256xf32>
    %280 = arith.addf %270, %279 : vector<8x256xf32>
    %281 = vector.extract_strided_slice %62 {offsets = [0, 32], sizes = [8, 224], strides = [1, 1]} : vector<8x256xf32> to vector<8x224xf32>
    %282 = vector.extract_strided_slice %62 {offsets = [0, 0], sizes = [8, 32], strides = [1, 1]} : vector<8x256xf32> to vector<8x32xf32>
    %283 = tpu.concatenate %281, %282 in 1 : vector<8x224xf32>, vector<8x32xf32> -> vector<8x256xf32>
    %c22 = arith.constant 22 : index
    %c0_91 = arith.constant 0 : index
    %284 = vector.load %arg6[%c22, %c0_91] : memref<25x256xf32, #tpu.memory_space<vmem>>, vector<1x256xf32>
    %285 = vector.broadcast %284 : vector<1x256xf32> to vector<8x256xf32>
    %286 = arith.mulf %285, %283 : vector<8x256xf32>
    %c0_92 = arith.constant 0 : index
    %c22_93 = arith.constant 22 : index
    %287 = vector.load %arg5[%c0_92, %c22_93] : memref<8x25xf32, #tpu.memory_space<vmem>>, vector<8x1xf32>
    %288 = vector.broadcast %287 : vector<8x1xf32> to vector<8x256xf32>
    %289 = arith.mulf %288, %286 : vector<8x256xf32>
    %290 = arith.addf %280, %289 : vector<8x256xf32>
    %291 = vector.extract_strided_slice %62 {offsets = [0, 33], sizes = [8, 223], strides = [1, 1]} : vector<8x256xf32> to vector<8x223xf32>
    %292 = vector.extract_strided_slice %62 {offsets = [0, 0], sizes = [8, 33], strides = [1, 1]} : vector<8x256xf32> to vector<8x33xf32>
    %293 = tpu.concatenate %291, %292 in 1 : vector<8x223xf32>, vector<8x33xf32> -> vector<8x256xf32>
    %c23 = arith.constant 23 : index
    %c0_94 = arith.constant 0 : index
    %294 = vector.load %arg6[%c23, %c0_94] : memref<25x256xf32, #tpu.memory_space<vmem>>, vector<1x256xf32>
    %295 = vector.broadcast %294 : vector<1x256xf32> to vector<8x256xf32>
    %296 = arith.mulf %295, %293 : vector<8x256xf32>
    %c0_95 = arith.constant 0 : index
    %c23_96 = arith.constant 23 : index
    %297 = vector.load %arg5[%c0_95, %c23_96] : memref<8x25xf32, #tpu.memory_space<vmem>>, vector<8x1xf32>
    %298 = vector.broadcast %297 : vector<8x1xf32> to vector<8x256xf32>
    %299 = arith.mulf %298, %296 : vector<8x256xf32>
    %300 = arith.addf %290, %299 : vector<8x256xf32>
    %301 = vector.extract_strided_slice %62 {offsets = [0, 34], sizes = [8, 222], strides = [1, 1]} : vector<8x256xf32> to vector<8x222xf32>
    %302 = vector.extract_strided_slice %62 {offsets = [0, 0], sizes = [8, 34], strides = [1, 1]} : vector<8x256xf32> to vector<8x34xf32>
    %303 = tpu.concatenate %301, %302 in 1 : vector<8x222xf32>, vector<8x34xf32> -> vector<8x256xf32>
    %c24 = arith.constant 24 : index
    %c0_97 = arith.constant 0 : index
    %304 = vector.load %arg6[%c24, %c0_97] : memref<25x256xf32, #tpu.memory_space<vmem>>, vector<1x256xf32>
    %305 = vector.broadcast %304 : vector<1x256xf32> to vector<8x256xf32>
    %306 = arith.mulf %305, %303 : vector<8x256xf32>
    %c0_98 = arith.constant 0 : index
    %c24_99 = arith.constant 24 : index
    %307 = vector.load %arg5[%c0_98, %c24_99] : memref<8x25xf32, #tpu.memory_space<vmem>>, vector<8x1xf32>
    %308 = vector.broadcast %307 : vector<8x1xf32> to vector<8x256xf32>
    %309 = arith.mulf %308, %306 : vector<8x256xf32>
    %310 = arith.addf %300, %309 : vector<8x256xf32>
    %c0_100 = arith.constant 0 : index
    %c0_101 = arith.constant 0 : index
    %311 = vector.load %arg7[%c0_100, %c0_101] : memref<8x1xf32, #tpu.memory_space<vmem>>, vector<8x1xf32>
    %312 = vector.broadcast %311 : vector<8x1xf32> to vector<8x256xf32>
    %313 = arith.mulf %310, %312 : vector<8x256xf32>
    %c0_102 = arith.constant 0 : index
    %c0_103 = arith.constant 0 : index
    %314 = vector.load %arg8[%c0_102, %c0_103] : memref<8x1xf32, #tpu.memory_space<vmem>>, vector<8x1xf32>
    %315 = vector.broadcast %314 : vector<8x1xf32> to vector<8x256xf32>
    %316 = arith.addf %313, %315 : vector<8x256xf32>
    %317 = arith.negf %316 : vector<8x256xf32>
    %318 = math.exp %317 : vector<8x256xf32>
    %cst_104 = arith.constant 1.000000e+00 : f32
    %319 = vector.broadcast %cst_104 : f32 to vector<8x256xf32>
    %320 = arith.addf %319, %318 : vector<8x256xf32>
    %321 = arith.divf %319, %320 : vector<8x256xf32>
    %322 = arith.mulf %316, %321 : vector<8x256xf32>
    %323 = tpu.concatenate %62, %322 in 0 : vector<8x256xf32>, vector<8x256xf32> -> vector<16x256xf32>
    %c0_105 = arith.constant 0 : index
    %c0_106 = arith.constant 0 : index
    %c0_107 = arith.constant 0 : index
    %324 = vector.load %arg9[%c0_105, %c0_106, %c0_107] : memref<1x16x256xf32, #tpu.memory_space<vmem>>, vector<1x16x256xf32>
    %325 = vector.shape_cast %324 : vector<1x16x256xf32> to vector<16x256xf32>
    %326 = vector.shape_cast %323 : vector<16x256xf32> to vector<1x16x256xf32>
    tpu.vector_store %arg9[%c0_105, %c0_106, %c0_107], %326 {strides = array<i32>} : memref<1x16x256xf32, #tpu.memory_space<vmem>>, vector<1x16x256xf32>,
    return
  }
  func.func @transform_0(%arg0: i32) -> (i32, i32, i32) {
    %c0_i32 = arith.constant 0 : i32
    %c0_i32_0 = arith.constant 0 : i32
    %c0_i32_1 = arith.constant 0 : i32
    return %arg0, %c0_i32, %c0_i32_0 : i32, i32, i32
  }
  func.func @transform_1(%arg0: i32) -> (i32, i32) {
    %c0_i32 = arith.constant 0 : i32
    %c0_i32_0 = arith.constant 0 : i32
    %c0_i32_1 = arith.constant 0 : i32
    return %c0_i32, %c0_i32_0 : i32, i32
  }
  func.func @transform_2(%arg0: i32) -> (i32, i32) {
    %c0_i32 = arith.constant 0 : i32
    %c0_i32_0 = arith.constant 0 : i32
    %c0_i32_1 = arith.constant 0 : i32
    return %c0_i32, %c0_i32_0 : i32, i32
  }
  func.func @transform_3(%arg0: i32) -> (i32, i32) {
    %c0_i32 = arith.constant 0 : i32
    %c0_i32_0 = arith.constant 0 : i32
    %c0_i32_1 = arith.constant 0 : i32
    return %c0_i32, %c0_i32_0 : i32, i32
  }
  func.func @transform_4(%arg0: i32) -> (i32, i32) {
    %c0_i32 = arith.constant 0 : i32
    %c0_i32_0 = arith.constant 0 : i32
    %c0_i32_1 = arith.constant 0 : i32
    return %c0_i32, %c0_i32_0 : i32, i32
  }
  func.func @transform_5(%arg0: i32) -> (i32, i32) {
    %c0_i32 = arith.constant 0 : i32
    %c0_i32_0 = arith.constant 0 : i32
    %c0_i32_1 = arith.constant 0 : i32
    return %c0_i32, %c0_i32_0 : i32, i32
  }
  func.func @transform_6(%arg0: i32) -> (i32, i32) {
    %c0_i32 = arith.constant 0 : i32
    %c0_i32_0 = arith.constant 0 : i32
    %c0_i32_1 = arith.constant 0 : i32
    return %c0_i32, %c0_i32_0 : i32, i32
  }
  func.func @transform_7(%arg0: i32) -> (i32, i32) {
    %c0_i32 = arith.constant 0 : i32
    %c0_i32_0 = arith.constant 0 : i32
    %c0_i32_1 = arith.constant 0 : i32
    return %c0_i32, %c0_i32_0 : i32, i32
  }
  func.func @transform_8(%arg0: i32) -> (i32, i32, i32) {
    %c0_i32 = arith.constant 0 : i32
    %c0_i32_0 = arith.constant 0 : i32
    %c0_i32_1 = arith.constant 0 : i32
    return %arg0, %c0_i32, %c0_i32_0 : i32, i32, i32
  }
}

</mosaic_0001>

<bundles_post_ra>
// kernel: ghost_conv.1
= control target key start
LH: loop header
LB: loop body
LE: loop exit
PB: predicated region body
PF: predicated region fallthrough
CT: control target
= control target key end

     0   :  { %s1625_s27 = smov 0   ;;  %s2044_s0 = inlined_call_operand.vmem [shape: f32[2,8,256], index: 0, kind: input, shape index: {}]   ;;  %s2045_s1 = inlined_call_operand.vmem [shape: f32[8,8], index: 1, kind: input, shape index: {}]   ;;  %s2046_s2 = inlined_call_operand.vmem [shape: f32[8,1], index: 2, kind: input, shape index: {}]   ;;  %s2047_s3 = inlined_call_operand.vmem [shape: f32[8,1], index: 3, kind: input, shape index: {}]   ;;  %s2048_s4 = inlined_call_operand.vmem [shape: f32[8,25], index: 4, kind: input, shape index: {}]   ;;  %s2049_s5 = inlined_call_operand.vmem [shape: f32[25,256], index: 5, kind: input, shape index: {}]   ;;  %s2050_s6 = inlined_call_operand.vmem [shape: f32[8,1], index: 6, kind: input, shape index: {}]   ;;  %s2051_s7 = inlined_call_operand.vmem [shape: f32[8,1], index: 7, kind: input, shape index: {}]   ;;  %s2052_s8 = inlined_call_operand.vmem [shape: f32[2,16,256], index: 8, kind: output, shape index: {}]  }
   0x1 LB: > { %s1375_s28 = sadd.s32 4294967295, %s1529_s27   ;;  %p1379_p0 = scmp.ge.s32.totalorder %s1529_s27, 1  ;;  %s1529_s27 = sphi %s1625_s27, %s18_s27  }
   0x2   : > { %p262_p1 = scmp.lt.s32.totalorder %s1529_s27, 3 }
   0x4   : > { %p263_p2 = pnand %p1379_p0, %p262_p1 }
   0x5   : > { %p296_p3 = scmp.lt.s32.totalorder (!%p263_p2), %s1375_s28, 1  ;;  %s1552_s23 = smov (!%p263_p2), 34  }
   0x6   : > { %266 = sbr.rel (%p263_p2) target bundleno = 536 (0x218), region = 52  ;;  %s1553_s24 = smov (!%p263_p2), 33  }
   0x7   : > { %s1555_s25 = smov (!%p263_p2), 14   ;;  %s1556_s26 = smov (!%p263_p2), 32  }
   0x8   : > { %s1558_s29 = smov (!%p263_p2), 127   ;;  %s1559_s30 = smov (!%p263_p2), 31  }
   0x9   : > { %s1560_s9 = smov (!%p263_p2), 126   ;;  %s1561_s10 = smov (!%p263_p2), 30  }
   0xa   : > { %s1563_s11 = smov (!%p263_p2), 18   ;;  %s1566_s12 = smov (!%p263_p2), 17  }
   0xb   : > { %v308_v0 = vld [vmem:[%s2045_s1] sm:$0xff]  ;;  %v1531_v1 = vmov 5   ;;  %v1532_v2 = vmov 2   ;;  %v1533_v3 = vmov 0   ;;  %v1534_v4 = vmov 3   ;;  %s2054_s28 = smov (!%p296_p3, %s1375_s28), 1 }
   0xc   : > { %1476 = vset.pattern.permute.xlu0 %v1531_v1  ;;  %1473 = vset.pattern.permute.xlu1 %v1532_v2  ;;  %v438_v5 = vld [vmem:[%s2046_s2] sm:$0xff]  ;;  %v1535_v6 = vmov 4   ;;  %v1536_v7 = vmov 1   ;;  %v1537_v8 = vmov 6   ;;  %v1538_v10 = vmov 7   ;;  %s1414_s15 = sshll.u32 %s2054_s28, 4 }
   0xd   : > { %391 = vperm.xlu0 %1476, %v308_v0   ;;  %343 = vperm.xlu1 %1473, %v308_v0   ;;  %v1643_v9 = vld [vmem:[%s2048_s4] sm:$0xff]  ;;  %v1539_v12 = vmov 9   ;;  %v1540_v13 = vmov 10   ;;  %v1541_v14 = vmov 13   ;;  %v1542_v15 = vmov 14   ;;  %s300_s18 = scalar_lea.vmem %s2044_s0, %s1414_s15  ;;  %s1415_s19 = sshll.u32 %s2054_s28, 5 }
   0xe   : > { %v446_v11 = vld [vmem:[%s2047_s3] sm:$0xff]  ;;  %v1543_v16 = vmov 8   ;;  %v1544_v17 = vmov 11   ;;  %v1545_v18 = vmov 12   ;;  %v1546_v19 = vmov 15   ;;  %v307_v36 = vld [vmem:[%s300_s18 + $0x8] sm:$0xff]  ;;  %s1693_s22 = scalar_lea.vmem %s2052_s8, %s1415_s19 }
   0xf   : > { %v1547_v20 = vmov 16   ;;  %v1548_v21 = vmov 17   ;;  %v1549_v22 = vmov 18   ;;  %v1550_v23 = vmov 19   ;;  %v306_v35 = vld [vmem:[%s300_s18] sm:$0xff]  ;;  %s1557_s28 = smov 2  }
  0x10   : > { %v1551_v24 = vmov 20   ;;  %v314_v27 = vlaneseq  ;;  %s1567_s15 = smov 16   ;;  %s1568_s16 = smov 15   ;;  %vm475_vm0 = vcmask 277504   ;;  %vm509_vm1 = vcmask 269312  }
  0x11   : > { %1477 = vset.pattern.permute.xlu0 %v1533_v3  ;;  %1474 = vset.pattern.permute.xlu1 %v1534_v4  ;;  %s1569_s17 = smov 1   ;;  %s1570_s18 = smov 114   ;;  %vm542_vm2 = vcmask 261120   ;;  %vm575_vm3 = vcmask 252928   ;;  %vm608_vm4 = vcmask 244736   ;;  %vm641_vm5 = vcmask 146432  }
  0x12   : > { %311 = vperm.xlu0 %1477, %v308_v0   ;;  %359 = vperm.xlu1 %1474, %v308_v0   ;;  %v315_v28 = vshrl.u32 %v314_v27, 7  ;;  %s1571_s19 = smov 113   ;;  %s1572_s20 = smov 112   ;;  %vm674_vm6 = vcmask 138240   ;;  %vm707_vm7 = vcmask 130048   ;;  %vm740_vm8 = vcmask 121856  }
  0x13   : > { %s1579_s21 = smov 94   ;;  %vm773_vm9 = vcmask 113664   ;;  %vm806_vm10 = vcmask 15360   ;;  %vm839_vm11 = vcmask 7168   ;;  %vm894_vm12 = vcmask 1039360  }
  0x14   : > { %v1678_v31 = vsub.s32 0, %v315_v28  ;;  %v1680_v32 = vsub.s32 1, %v315_v28  ;;  %v348_v33 = vsub.s32 2, %v315_v28  ;;  %v364_v37 = vsub.s32 3, %v315_v28 }
  0x15   : > { %v380_v42 = vsub.s32 4, %v315_v28  ;;  %v396_v46 = vsub.s32 5, %v315_v28  ;;  %v412_v56 = vsub.s32 6, %v315_v28  ;;  %v428_v57 = vsub.s32 7, %v315_v28 }
  0x16   : > { %441 = vperm.xlu0 %1477, %v438_v5   ;;  %1475 = vset.pattern.permute.xlu1 %v1535_v6  ;;  %v317_v38 = vrot.slane %v306_v35, %v1678_v31  ;;  %v321_v39 = vrot.slane %v307_v36, %v1678_v31  ;;  %v333_v40 = vrot.slane %v306_v35, %v1680_v32  ;;  %vm927_vm13 = vcmask 1031168  }
  0x17   : > { %375 = vperm.xlu1 %1475, %v308_v0   ;;  %v337_v41 = vrot.slane %v307_v36, %v1680_v32  ;;  %v349_v44 = vrot.slane %v306_v35, %v348_v33  ;;  %v353_v45 = vrot.slane %v307_v36, %v348_v33  ;;  %v365_v47 = vrot.slane %v306_v35, %v364_v37 }
  0x18   : > { %v369_v48 = vrot.slane %v307_v36, %v364_v37  ;;  %v381_v54 = vrot.slane %v306_v35, %v380_v42  ;;  %v385_v55 = vrot.slane %v307_v36, %v380_v42  ;;  %v397_v62 = vrot.slane %v306_v35, %v396_v46 }
  0x19   : > { %v401_v63 = vrot.slane %v307_v36, %v396_v46  ;;  %vm960_vm14 = vcmask 932864   ;;  %vm993_vm15 = vcmask 924672  }
  0x1a   : > { %1480 = vset.pattern.permute.xlu0 %v1536_v7  ;;  %v417_v7 = vrot.slane %v307_v36, %v412_v56 }
  0x1b   : > { %327 = vperm.xlu0 %1480, %v308_v0   ;;  %1478 = vset.pattern.permute.xlu1 %v1537_v8 }
  0x1c   : > { %407 = vperm.xlu1 %1478, %v308_v0  }
  0x1f   : > { %530 = vperm.xlu0 %1480, %v1643_v9  }
  0x20   : > { %1479 = vset.pattern.permute.xlu1 %v1538_v10 }
  0x21   : > { %423 = vperm.xlu1 %1479, %v308_v0  }
  0x23   : > { %1482 = vset.pattern.permute.xlu0 %v1532_v2 }
  0x24   : > { %563 = vperm.xlu0 %1482, %v1643_v9  }
  0x25   : > { %1481 = vset.pattern.permute.xlu1 %v1533_v3 }
  0x26   : > { %449 = vperm.xlu1 %1481, %v446_v11  }
  0x28   : > { %1483 = vset.pattern.permute.xlu0 %v1534_v4 }
  0x29   : > { %596 = vperm.xlu0 %1483, %v1643_v9  }
  0x2a   : > { %497 = vperm.xlu1 %1481, %v1643_v9  }
  0x2d   : > { %1484 = vset.pattern.permute.xlu0 %v1535_v6  ;;  %v413_v6 = vrot.slane %v306_v35, %v412_v56 }
  0x2e   : > { %629 = vperm.xlu0 %1484, %v1643_v9   ;;  %1489 = vset.pattern.permute.xlu1 %v1539_v12 }
  0x2f   : > { %794 = vperm.xlu1 %1489, %v1643_v9  }
  0x32   : > { %1485 = vset.pattern.permute.xlu0 %v1531_v1 }
  0x33   : > { %662 = vperm.xlu0 %1485, %v1643_v9   ;;  %1490 = vset.pattern.permute.xlu1 %v1540_v13 }
  0x34   : > { %827 = vperm.xlu1 %1490, %v1643_v9  }
  0x37   : > { %1486 = vset.pattern.permute.xlu0 %v1537_v8  ;;  %v429_v8 = vrot.slane %v306_v35, %v428_v57 }
  0x38   : > { %695 = vperm.xlu0 %1486, %v1643_v9   ;;  %1493 = vset.pattern.permute.xlu1 %v1541_v14 }
  0x39   : > { %916 = vperm.xlu1 %1493, %v1643_v9  }
  0x3c   : > { %1487 = vset.pattern.permute.xlu0 %v1538_v10  ;;  %v433_v10 = vrot.slane %v307_v36, %v428_v57 }
  0x3d   : > { %728 = vperm.xlu0 %1487, %v1643_v9   ;;  %1494 = vset.pattern.permute.xlu1 %v1542_v15 }
  0x3e   : > { %949 = vperm.xlu1 %1494, %v1643_v9  }
  0x41   : > { %1488 = vset.pattern.permute.xlu0 %v1543_v16 }
  0x42   : > { %761 = vperm.xlu0 %1488, %v1643_v9   ;;  %1506 = vset.pattern.permute.xlu1 %v1533_v3 }
  0x46   : > { %1491 = vset.pattern.permute.xlu0 %v1544_v17 }
  0x47   : > { %860 = vperm.xlu0 %1491, %v1643_v9  }
  0x4b   : > { %1492 = vset.pattern.permute.xlu0 %v1545_v18 }
  0x4c   : > { %883 = vperm.xlu0 %1492, %v1643_v9  }
  0x50   : > { %1495 = vset.pattern.permute.xlu0 %v1546_v19 }
  0x51   : > { %982 = vperm.xlu0 %1495, %v1643_v9  }
  0x55   : > { %1496 = vset.pattern.permute.xlu0 %v1547_v20 }
  0x56   : > { %1015 = vperm.xlu0 %1496, %v1643_v9  }
  0x5a   : > { %1497 = vset.pattern.permute.xlu0 %v1548_v21 }
  0x5b   : > { %1048 = vperm.xlu0 %1497, %v1643_v9  }
  0x5f   : > { %1498 = vset.pattern.permute.xlu0 %v1549_v22 }
  0x60   : > { %1081 = vperm.xlu0 %1498, %v1643_v9  }
  0x64   : > { %1499 = vset.pattern.permute.xlu0 %v1550_v23 }
  0x65   : > { %1114 = vperm.xlu0 %1499, %v1643_v9  }
  0x69   : > { %1500 = vset.pattern.permute.xlu0 %v1551_v24 }
  0x6a   : > { %1147 = vperm.xlu0 %1500, %v1643_v9  }
  0x88   : > { %v392_v25 = vpop.permute.xlu0 %391  ;;  %v344_v26 = vpop.permute.xlu1 %343 }
  0x89   : > { %v354_v58 = vmul.f32 %v349_v44, %v344_v26  ;;  %v355_v59 = vmul.f32 %v353_v45, %v344_v26  ;;  %v402_v15 = vmul.f32 %v397_v62, %v392_v25  ;;  %v403_v16 = vmul.f32 %v401_v63, %v392_v25 }
  0x8d   : > { %v312_v29 = vpop.permute.xlu0 %311  ;;  %v360_v30 = vpop.permute.xlu1 %359 }
  0x8e   : > { %v322_v50 = vmul.f32 %v317_v38, %v312_v29  ;;  %v323_v51 = vmul.f32 %v321_v39, %v312_v29  ;;  %v370_v1 = vmul.f32 %v365_v47, %v360_v30  ;;  %v371_v2 = vmul.f32 %v369_v48, %v360_v30 }
  0x8f   : > { %v1554_v47 = vmov 21  }
  0x90   : > { %1501 = vset.pattern.permute.xlu0 %v1554_v47 }
  0x91   : > { %v442_v34 = vpop.permute.xlu0 %441 }
  0x92   : > { %v376_v43 = vpop.permute.xlu1 %375 }
  0x93   : > { %v386_v13 = vmul.f32 %v381_v54, %v376_v43  ;;  %v387_v14 = vmul.f32 %v385_v55, %v376_v43  ;;  %v1565_v54 = vmov 24   ;;  %v1286_v55 = vld [vmem:[%s2050_s6] sm:$0xff] }
  0x96   : > { %v328_v49 = vpop.permute.xlu0 %327 }
  0x97   : > { %v338_v52 = vmul.f32 %v333_v40, %v328_v49  ;;  %v339_v53 = vmul.f32 %v337_v41, %v328_v49  ;;  %v408_v0 = vpop.permute.xlu1 %407 }
  0x98   : > { %v418_v19 = vmul.f32 %v413_v6, %v408_v0  ;;  %v419_v20 = vmul.f32 %v417_v7, %v408_v0 }
  0x99   : > { %v340_v60 = vadd.f32 %v338_v52, %v322_v50  ;;  %v341_v61 = vadd.f32 %v339_v53, %v323_v51  ;;  %v1562_v50 = vmov 22   ;;  %v1564_v52 = vmov 23  }
  0x9a   : > { %v1719_v48 = vpop.permute.xlu0 %530 }
  0x9b   : > { %v356_v4 = vadd.f32 %v354_v58, %v340_v60  ;;  %v357_v5 = vadd.f32 %v355_v59, %v341_v61 }
  0x9c   : > { %v424_v21 = vpop.permute.xlu1 %423 }
  0x9d   : > { %v372_v11 = vadd.f32 %v370_v1, %v356_v4  ;;  %v373_v12 = vadd.f32 %v371_v2, %v357_v5  ;;  %v434_v24 = vmul.f32 %v429_v8, %v424_v21  ;;  %v435_v26 = vmul.f32 %v433_v10, %v424_v21  ;;  %v480_v8 = vld [vmem:[%s2049_s5] ss:$8 sm:$0x3] }
  0x9f   : > { %v388_v17 = vadd.f32 %v386_v13, %v372_v11  ;;  %v389_v18 = vadd.f32 %v387_v14, %v373_v12  ;;  %v1723_v49 = vpop.permute.xlu0 %563  ;;  %v1386_v11 = vld [vmem:[%s2049_s5 + $0x1] ss:$8 sm:$0x3]  ;;  %v485_v13 = vrot.slane %v480_v8, %v1678_v31  ;;  %v489_v14 = vrot.slane %v480_v8, %v1680_v32 }
  0xa1   : > { %v404_v22 = vadd.f32 %v402_v15, %v388_v17  ;;  %v405_v23 = vadd.f32 %v403_v16, %v389_v18  ;;  %v450_v36 = vpop.permute.xlu1 %449  ;;  %v520_v17 = vrot.slane %v1386_v11, %v1678_v31  ;;  %v524_v18 = vrot.slane %v1386_v11, %v1680_v32 }
  0xa3   : > { %v420_v27 = vadd.f32 %v418_v19, %v404_v22  ;;  %v421_v28 = vadd.f32 %v419_v20, %v405_v23 }
  0xa4   : > { %v1727_v51 = vpop.permute.xlu0 %596 }
  0xa5   : > { %v436_v29 = vadd.f32 %v434_v24, %v420_v27  ;;  %v437_v30 = vadd.f32 %v435_v26, %v421_v28  ;;  %v498_v62 = vpop.permute.xlu1 %497  ;;  %v1387_v28 = vld [vmem:[%s2049_s5 + $0x2] ss:$8 sm:$0x3] }
  0xa7   : > { %v444_v33 = vmul.f32 %v442_v34, %v436_v29  ;;  %v445_v35 = vmul.f32 %v442_v34, %v437_v30 }
  0xa9   : > { %v452_v37 = vadd.f32 %v450_v36, %v444_v33  ;;  %v453_v38 = vadd.f32 %v450_v36, %v445_v35  ;;  %v1732_v53 = vpop.permute.xlu0 %629 }
  0xaa   : > { %v1774_v0 = vpop.permute.xlu1 %794 }
  0xab   : > { %v1384_v25 = vmul.f32 -1.442695, %v452_v37  ;;  %v1385_v39 = vmul.f32 -1.442695, %v453_v38 }
  0xad   : > { %1507 = vpow2.f32 %v1384_v25  ;;  %v553_v25 = vrot.slane %v1387_v28, %v1678_v31 }
  0xae   : > { %1509 = vpow2.f32 %v1385_v39  ;;  %v1740_v56 = vpop.permute.xlu0 %662  ;;  %v557_v39 = vrot.slane %v1387_v28, %v1680_v32 }
  0xaf   : > { %v1780_v2 = vpop.permute.xlu1 %827 }
  0xb3   : > { %v1744_v57 = vpop.permute.xlu0 %695 }
  0xb4   : > { %v1785_v5 = vpop.permute.xlu1 %916 }
  0xb9   : > { %v1791_v7 = vpop.permute.xlu1 %949 }
  0xba   : > { %v1508_v40 = vpop.eup %1507 }
  0xbb   : > { %v1510_v41 = vpop.eup %1509  ;;  %v460_v42 = vadd.f32 1.0, %v1508_v40 }
  0xbc   : > { %v461_v43 = vadd.f32 1.0, %v1510_v41 }
  0xbd   : > { %1511 = vrcp.f32 %v460_v42 }
  0xbe   : > { %1513 = vrcp.f32 %v461_v43 }
  0xca   : > { %v1512_v44 = vpop.eup %1511 }
  0xcb   : > { %v1514_v34 = vpop.eup %1513  ;;  %v1695_v45 = vmul.f32 %v1512_v44, %v452_v37 }
  0xcc   : > { %v1697_v46 = vmul.f32 %v1514_v34, %v453_v38  ;;  %v1388_v34 = vld [vmem:[%s2049_s5 + $0x3] ss:$8 sm:$0x3] }
  0xcd   : > { %473 = vrot.lane.b32.xlu0 %v1695_v45, %s1552_s23  ;;  %1316 = vst [vmem:[%s1693_s22] sm:$0xff] %v1695_v45 }
  0xce   : > { %469 = vrot.lane.b32.xlu1 %v1697_v46, %s1552_s23  ;;  %1317 = vst [vmem:[%s1693_s22 + $0x8] sm:$0xff] %v1697_v46 }
  0xd1   : > { %504 = vrot.lane.b32.xlu0 %v1697_v46, %s1553_s24 }
  0xd2   : > { %507 = vrot.lane.b32.xlu1 %v1695_v45, %s1553_s24  ;;  %s1573_s24 = smov 111  }
  0xd5   : > { %771 = vrot.lane.b32.xlu0 %v1695_v45, %s1555_s25 }
  0xd6   : > { %537 = vrot.lane.b32.xlu1 %v1697_v46, %s1556_s26 }
  0xd9   : > { %801 = vrot.lane.b32.xlu0 %v1697_v46, %s1557_s28 }
  0xda   : > { %540 = vrot.lane.b32.xlu1 %v1695_v45, %s1556_s26 }
  0xdd   : > { %892 = vrot.lane.b32.xlu0 %v1697_v46, %s1558_s29 }
  0xde   : > { %570 = vrot.lane.b32.xlu1 %v1697_v46, %s1559_s30 }
  0xe1   : > { %923 = vrot.lane.b32.xlu0 %v1695_v45, %s1560_s9 }
  0xe2   : > { %573 = vrot.lane.b32.xlu1 %v1695_v45, %s1559_s30 }
  0xe5   : > { %1180 = vperm.xlu0 %1501, %v1643_v9  }
  0xe6   : > { %603 = vrot.lane.b32.xlu1 %v1697_v46, %s1561_s10 }
  0xe9   : > { %1502 = vset.pattern.permute.xlu0 %v1562_v50 }
  0xea   : > { %606 = vrot.lane.b32.xlu1 %v1695_v45, %s1561_s10  ;;  %1213 = vperm.xlu0 %1502, %v1643_v9  }
  0xee   : > { %636 = vrot.lane.b32.xlu1 %v1697_v46, %s1563_s11  ;;  %1503 = vset.pattern.permute.xlu0 %v1564_v52 }
  0xef   : > { %1246 = vperm.xlu0 %1503, %v1643_v9  }
  0xf2   : > { %639 = vrot.lane.b32.xlu1 %v1695_v45, %s1563_s11 }
  0xf3   : > { %1504 = vset.pattern.permute.xlu0 %v1565_v54 }
  0xf4   : > { %1279 = vperm.xlu0 %1504, %v1643_v9   ;;  %v1747_v9 = vpop.permute.xlu0 %728 }
  0xf6   : > { %669 = vrot.lane.b32.xlu1 %v1697_v46, %s1566_s12 }
  0xf8   : > { %1505 = vset.pattern.permute.xlu0 %v1533_v3  ;;  %v1751_v3 = vpop.permute.xlu0 %761 }
  0xf9   : > { %1289 = vperm.xlu0 %1505, %v1286_v55   ;;  %v586_v55 = vrot.slane %v1388_v34, %v1678_v31 }
  0xfa   : > { %672 = vrot.lane.b32.xlu1 %v1695_v45, %s1566_s12  ;;  %s1576_s12 = smov 97  }
  0xfc   : > { %v1755_v58 = vpop.permute.xlu0 %860 }
  0xfe   : > { %702 = vrot.lane.b32.xlu1 %v1697_v46, %s1567_s15 }
 0x100   : > { %v1760_v59 = vpop.permute.xlu0 %883 }
 0x102   : > { %705 = vrot.lane.b32.xlu1 %v1695_v45, %s1567_s15  ;;  %s1577_s15 = smov 96  }
 0x104   : > { %v1763_v60 = vpop.permute.xlu0 %982 }
 0x106   : > { %735 = vrot.lane.b32.xlu1 %v1697_v46, %s1568_s16 }
 0x108   : > { %v1767_v61 = vpop.permute.xlu0 %1015 }
 0x10a   : > { %738 = vrot.lane.b32.xlu1 %v1695_v45, %s1568_s16 }
 0x10c   : > { %v1772_v63 = vpop.permute.xlu0 %1048 }
 0x10e   : > { %768 = vrot.lane.b32.xlu1 %v1697_v46, %s1555_s25 }
 0x110   : > { %v1777_v1 = vpop.permute.xlu0 %1081 }
 0x112   : > { %804 = vrot.lane.b32.xlu1 %v1695_v45, %s1557_s28  ;;  %s1574_s28 = smov 110  }
 0x114   : > { %v1783_v4 = vpop.permute.xlu0 %1114 }
 0x116   : > { %834 = vrot.lane.b32.xlu1 %v1697_v46, %s1569_s17 }
 0x118   : > { %v1788_v6 = vpop.permute.xlu0 %1147 }
 0x11a   : > { %837 = vrot.lane.b32.xlu1 %v1695_v45, %s1569_s17 }
 0x11e   : > { %890 = vrot.lane.b32.xlu1 %v1695_v45, %s1558_s29 }
 0x122   : > { %925 = vrot.lane.b32.xlu1 %v1697_v46, %s1560_s9  ;;  %s1575_s9 = smov 98  }
 0x126   : > { %956 = vrot.lane.b32.xlu1 %v1695_v45, %s1570_s18 }
 0x12a   : > { %958 = vrot.lane.b32.xlu1 %v1697_v46, %s1570_s18  ;;  %s1578_s18 = smov 95  }
 0x12e   : > { %989 = vrot.lane.b32.xlu1 %v1695_v45, %s1571_s19 }
 0x132   : > { %991 = vrot.lane.b32.xlu1 %v1697_v46, %s1571_s19 }
 0x136   : > { %1022 = vrot.lane.b32.xlu1 %v1695_v45, %s1572_s20 }
 0x13a   : > { %1024 = vrot.lane.b32.xlu1 %v1697_v46, %s1572_s20 }
 0x13e   : > { %1055 = vrot.lane.b32.xlu1 %v1695_v45, %s1573_s24 }
 0x13f   : > { %v474_v10 = vpop.permute.xlu0 %473 }
 0x140   : > { %v470_v12 = vpop.permute.xlu1 %469 }
 0x141   : > { %v476_v15 = vsel %vm475_vm0, %v474_v10, %v470_v12  ;;  %v479_v16 = vsel %vm475_vm0, %v470_v12, %v474_v10  ;;  %vm1026_vm0 = vcmask 916480  }
 0x142   : > { %1057 = vrot.lane.b32.xlu1 %v1697_v46, %s1573_s24  ;;  %v492_v20 = vmul.f32 %v485_v13, %v479_v16  ;;  %v493_v21 = vmul.f32 %v489_v14, %v476_v15 }
 0x143   : > { %v505_v19 = vpop.permute.xlu0 %504 }
 0x144   : > { %v508_v22 = vpop.permute.xlu1 %507  ;;  %v500_v29 = vmul.f32 %v498_v62, %v492_v20  ;;  %v501_v30 = vmul.f32 %v498_v62, %v493_v21  ;;  %v590_v62 = vrot.slane %v1388_v34, %v1680_v32 }
 0x145   : > { %v510_v23 = vsel %vm509_vm1, %v508_v22, %v505_v19  ;;  %v513_v24 = vsel %vm509_vm1, %v505_v19, %v508_v22  ;;  %vm1059_vm1 = vcmask 908288  }
 0x146   : > { %v527_v26 = vmul.f32 %v520_v17, %v513_v24  ;;  %v528_v27 = vmul.f32 %v524_v18, %v510_v23  ;;  %1088 = vrot.lane.b32.xlu1 %v1695_v45, %s1574_s28 }
 0x148   : > { %v533_v33 = vmul.f32 %v1719_v48, %v527_v26  ;;  %v534_v35 = vmul.f32 %v1719_v48, %v528_v27  ;;  %v538_v36 = vpop.permute.xlu1 %537 }
 0x14a   : > { %v535_v37 = vadd.f32 %v533_v33, %v500_v29  ;;  %v536_v38 = vadd.f32 %v534_v35, %v501_v30  ;;  %1090 = vrot.lane.b32.xlu1 %v1697_v46, %s1574_s28 }
 0x14c   : > { %v541_v40 = vpop.permute.xlu1 %540 }
 0x14d   : > { %v543_v41 = vsel %vm542_vm2, %v541_v40, %v538_v36  ;;  %v546_v42 = vsel %vm542_vm2, %v538_v36, %v541_v40  ;;  %vm1092_vm2 = vcmask 900096  }
 0x14e   : > { %v560_v43 = vmul.f32 %v553_v25, %v546_v42  ;;  %v561_v44 = vmul.f32 %v557_v39, %v543_v41  ;;  %1121 = vrot.lane.b32.xlu1 %v1695_v45, %s1575_s9 }
 0x150   : > { %v566_v47 = vmul.f32 %v1723_v49, %v560_v43  ;;  %v567_v48 = vmul.f32 %v1723_v49, %v561_v44  ;;  %v571_v50 = vpop.permute.xlu1 %570  ;;  %v1389_v49 = vld [vmem:[%s2049_s5 + $0x4] ss:$8 sm:$0x3] }
 0x151   : > { %v619_v19 = vrot.slane %v1389_v49, %v1678_v31  ;;  %v623_v20 = vrot.slane %v1389_v49, %v1680_v32 }
 0x152   : > { %v568_v52 = vadd.f32 %v566_v47, %v535_v37  ;;  %v569_v54 = vadd.f32 %v567_v48, %v536_v38  ;;  %1123 = vrot.lane.b32.xlu1 %v1697_v46, %s1575_s9 }
 0x154   : > { %v574_v8 = vpop.permute.xlu1 %573 }
 0x155   : > { %v576_v10 = vsel %vm575_vm3, %v574_v8, %v571_v50  ;;  %v579_v11 = vsel %vm575_vm3, %v571_v50, %v574_v8  ;;  %vm1125_vm3 = vcmask 801792  }
 0x156   : > { %v593_v12 = vmul.f32 %v586_v55, %v579_v11  ;;  %v594_v13 = vmul.f32 %v590_v62, %v576_v10  ;;  %1154 = vrot.lane.b32.xlu1 %v1695_v45, %s1576_s12 }
 0x158   : > { %v599_v14 = vmul.f32 %v1727_v51, %v593_v12  ;;  %v600_v15 = vmul.f32 %v1727_v51, %v594_v13  ;;  %v604_v16 = vpop.permute.xlu1 %603  ;;  %v1390_v51 = vld [vmem:[%s2049_s5 + $0x5] ss:$8 sm:$0x3] }
 0x159   : > { %v652_v35 = vrot.slane %v1390_v51, %v1678_v31  ;;  %v656_v36 = vrot.slane %v1390_v51, %v1680_v32 }
 0x15a   : > { %v601_v17 = vadd.f32 %v599_v14, %v568_v52  ;;  %v602_v18 = vadd.f32 %v600_v15, %v569_v54  ;;  %1156 = vrot.lane.b32.xlu1 %v1697_v46, %s1576_s12  ;;  %v1294_v15 = vld [vmem:[%s2051_s7] sm:$0xff] }
 0x15c   : > { %v607_v21 = vpop.permute.xlu1 %606 }
 0x15d   : > { %v609_v22 = vsel %vm608_vm4, %v607_v21, %v604_v16  ;;  %v612_v23 = vsel %vm608_vm4, %v604_v16, %v607_v21  ;;  %vm1158_vm4 = vcmask 793600  }
 0x15e   : > { %v626_v24 = vmul.f32 %v619_v19, %v612_v23  ;;  %v627_v26 = vmul.f32 %v623_v20, %v609_v22  ;;  %1187 = vrot.lane.b32.xlu1 %v1695_v45, %s1577_s15 }
 0x160   : > { %v632_v27 = vmul.f32 %v1732_v53, %v626_v24  ;;  %v633_v28 = vmul.f32 %v1732_v53, %v627_v26  ;;  %v637_v29 = vpop.permute.xlu1 %636  ;;  %v1391_v53 = vld [vmem:[%s2049_s5 + $0x6] ss:$8 sm:$0x3] }
 0x161   : > { %v685_v47 = vrot.slane %v1391_v53, %v1678_v31  ;;  %v689_v48 = vrot.slane %v1391_v53, %v1680_v32 }
 0x162   : > { %v634_v30 = vadd.f32 %v632_v27, %v601_v17  ;;  %v635_v33 = vadd.f32 %v633_v28, %v602_v18  ;;  %1189 = vrot.lane.b32.xlu1 %v1697_v46, %s1577_s15  ;;  %v1394_v28 = vld [vmem:[%s2049_s5 + $0x11] ss:$8 sm:$0x3] }
 0x164   : > { %v640_v37 = vpop.permute.xlu1 %639 }
 0x165   : > { %v642_v38 = vsel %vm641_vm5, %v640_v37, %v637_v29  ;;  %v645_v25 = vsel %vm641_vm5, %v637_v29, %v640_v37  ;;  %vm1191_vm5 = vcmask 785408  }
 0x166   : > { %v659_v39 = vmul.f32 %v652_v35, %v645_v25  ;;  %v660_v40 = vmul.f32 %v656_v36, %v642_v38  ;;  %1220 = vrot.lane.b32.xlu1 %v1695_v45, %s1578_s18  ;;  %v772_v35 = vpop.permute.xlu0 %771  ;;  %v788_v38 = vrot.slane %v1394_v28, %v1680_v32  ;;  %v1395_v25 = vld [vmem:[%s2049_s5 + $0x12] ss:$8 sm:$0x3] }
 0x168   : > { %v665_v41 = vmul.f32 %v1740_v56, %v659_v39  ;;  %v666_v42 = vmul.f32 %v1740_v56, %v660_v40  ;;  %v670_v43 = vpop.permute.xlu1 %669  ;;  %v1392_v56 = vld [vmem:[%s2049_s5 + $0x7] ss:$8 sm:$0x3] }
 0x169   : > { %v718_v49 = vrot.slane %v1392_v56, %v1678_v31  ;;  %v722_v14 = vrot.slane %v1392_v56, %v1680_v32 }
 0x16a   : > { %v667_v44 = vadd.f32 %v665_v41, %v634_v30  ;;  %v668_v34 = vadd.f32 %v666_v42, %v635_v33  ;;  %1222 = vrot.lane.b32.xlu1 %v1697_v46, %s1578_s18 }
 0x16c   : > { %v673_v50 = vpop.permute.xlu1 %672 }
 0x16d   : > { %v675_v52 = vsel %vm674_vm6, %v673_v50, %v670_v43  ;;  %v678_v54 = vsel %vm674_vm6, %v670_v43, %v673_v50  ;;  %v817_v43 = vrot.slane %v1395_v25, %v1678_v31  ;;  %vm1224_vm6 = vcmask 777216  }
 0x16e   : > { %v692_v55 = vmul.f32 %v685_v47, %v678_v54  ;;  %v693_v62 = vmul.f32 %v689_v48, %v675_v52  ;;  %1253 = vrot.lane.b32.xlu1 %v1695_v45, %s1579_s21  ;;  %v802_v52 = vpop.permute.xlu0 %801 }
 0x170   : > { %v698_v8 = vmul.f32 %v1744_v57, %v692_v55  ;;  %v699_v10 = vmul.f32 %v1744_v57, %v693_v62  ;;  %v703_v11 = vpop.permute.xlu1 %702  ;;  %v1393_v57 = vld [vmem:[%s2049_s5 + $0x10] ss:$8 sm:$0x3] }
 0x171   : > { %v751_v51 = vrot.slane %v1393_v57, %v1678_v31  ;;  %v755_v27 = vrot.slane %v1393_v57, %v1680_v32 }
 0x172   : > { %v700_v12 = vadd.f32 %v698_v8, %v667_v44  ;;  %v701_v13 = vadd.f32 %v699_v10, %v668_v34  ;;  %1255 = vrot.lane.b32.xlu1 %v1697_v46, %s1579_s21  ;;  %v821_v44 = vrot.slane %v1395_v25, %v1680_v32 }
 0x174   : > { %v706_v16 = vpop.permute.xlu1 %705 }
 0x175   : > { %v708_v17 = vsel %vm707_vm7, %v706_v16, %v703_v11  ;;  %v711_v18 = vsel %vm707_vm7, %v703_v11, %v706_v16  ;;  %vm1257_vm7 = vcmask 769024  }
 0x176   : > { %v725_v19 = vmul.f32 %v718_v49, %v711_v18  ;;  %v726_v20 = vmul.f32 %v722_v14, %v708_v17  ;;  %1297 = vperm.xlu1 %1506, %v1294_v15  }
 0x178   : > { %v731_v21 = vmul.f32 %v1747_v9, %v725_v19  ;;  %v732_v22 = vmul.f32 %v1747_v9, %v726_v20  ;;  %v736_v23 = vpop.permute.xlu1 %735  ;;  %v784_v9 = vrot.slane %v1394_v28, %v1678_v31 }
 0x17a   : > { %v733_v24 = vadd.f32 %v731_v21, %v700_v12  ;;  %v734_v26 = vadd.f32 %v732_v22, %v701_v13  ;;  %v1396_v13 = vld [vmem:[%s2049_s5 + $0x13] ss:$8 sm:$0x3] }
 0x17b   : > { %v854_v18 = vrot.slane %v1396_v13, %v1680_v32 }
 0x17c   : > { %v739_v29 = vpop.permute.xlu1 %738 }
 0x17d   : > { %v741_v30 = vsel %vm740_vm8, %v739_v29, %v736_v23  ;;  %v744_v33 = vsel %vm740_vm8, %v736_v23, %v739_v29 }
 0x17e   : > { %v758_v36 = vmul.f32 %v751_v51, %v744_v33  ;;  %v759_v37 = vmul.f32 %v755_v27, %v741_v30 }
 0x180   : > { %v764_v39 = vmul.f32 %v1751_v3, %v758_v36  ;;  %v765_v40 = vmul.f32 %v1751_v3, %v759_v37  ;;  %v769_v53 = vpop.permute.xlu1 %768 }
 0x181   : > { %v774_v41 = vsel %vm773_vm9, %v772_v35, %v769_v53  ;;  %v777_v42 = vsel %vm773_vm9, %v769_v53, %v772_v35 }
 0x182   : > { %v766_v34 = vadd.f32 %v764_v39, %v733_v24  ;;  %v767_v47 = vadd.f32 %v765_v40, %v734_v26  ;;  %v791_v48 = vmul.f32 %v784_v9, %v777_v42  ;;  %v792_v50 = vmul.f32 %v788_v38, %v774_v41  ;;  %v893_v41 = vpop.permute.xlu0 %892  ;;  %v1398_v42 = vld [vmem:[%s2049_s5 + $0x15] ss:$8 sm:$0x3] }
 0x184   : > { %v797_v54 = vmul.f32 %v1774_v0, %v791_v48  ;;  %v798_v55 = vmul.f32 %v1774_v0, %v792_v50  ;;  %v805_v62 = vpop.permute.xlu1 %804  ;;  %v850_v0 = vrot.slane %v1396_v13, %v1678_v31  ;;  %v906_v48 = vrot.slane %v1398_v42, %v1678_v31 }
 0x185   : > { %v807_v56 = vsel %vm806_vm10, %v805_v62, %v802_v52  ;;  %v810_v3 = vsel %vm806_vm10, %v802_v52, %v805_v62  ;;  %v910_v50 = vrot.slane %v1398_v42, %v1680_v32  ;;  %v1400_v52 = vld [vmem:[%s2049_s5 + $0x17] ss:$8 sm:$0x3] }
 0x186   : > { %v799_v8 = vadd.f32 %v797_v54, %v766_v34  ;;  %v800_v10 = vadd.f32 %v798_v55, %v767_v47  ;;  %v824_v11 = vmul.f32 %v817_v43, %v810_v3  ;;  %v825_v12 = vmul.f32 %v821_v44, %v807_v56  ;;  %v1399_v34 = vld [vmem:[%s2049_s5 + $0x16] ss:$8 sm:$0x3]  ;;  %v1401_v56 = vld [vmem:[%s2049_s5 + $0x20] ss:$8 sm:$0x3]  ;;  %v924_v3 = vpop.permute.xlu0 %923 }
 0x187   : > { %v939_v62 = vrot.slane %v1399_v34, %v1678_v31 }
 0x188   : > { %v830_v49 = vmul.f32 %v1780_v2, %v824_v11  ;;  %v831_v14 = vmul.f32 %v1780_v2, %v825_v12  ;;  %v835_v15 = vpop.permute.xlu1 %834  ;;  %v976_v11 = vrot.slane %v1400_v52, %v1680_v32  ;;  %v1402_v12 = vld [vmem:[%s2049_s5 + $0x21] ss:$8 sm:$0x3] }
 0x18a   : > { %v832_v16 = vadd.f32 %v830_v49, %v799_v8  ;;  %v833_v17 = vadd.f32 %v831_v14, %v800_v10  ;;  %v943_v8 = vrot.slane %v1399_v34, %v1680_v32  ;;  %v972_v10 = vrot.slane %v1400_v52, %v1678_v31 }
 0x18c   : > { %v838_v19 = vpop.permute.xlu1 %837 }
 0x18d   : > { %v840_v20 = vsel %vm839_vm11, %v838_v19, %v835_v15  ;;  %v843_v57 = vsel %vm839_vm11, %v835_v15, %v838_v19 }
 0x18e   : > { %v857_v21 = vmul.f32 %v850_v0, %v843_v57  ;;  %v858_v22 = vmul.f32 %v854_v18, %v840_v20  ;;  %v1009_v0 = vrot.slane %v1401_v56, %v1680_v32  ;;  %v1038_v20 = vrot.slane %v1402_v12, %v1678_v31 }
 0x18f   : > { %v1042_v57 = vrot.slane %v1402_v12, %v1680_v32 }
 0x190   : > { %v863_v23 = vmul.f32 %v1755_v58, %v857_v21  ;;  %v864_v24 = vmul.f32 %v1755_v58, %v858_v22  ;;  %v891_v26 = vpop.permute.xlu1 %890  ;;  %v1397_v58 = vld [vmem:[%s2049_s5 + $0x14] ss:$8 sm:$0x3] }
 0x191   : > { %v873_v39 = vrot.slane %v1397_v58, %v1678_v31  ;;  %v877_v40 = vrot.slane %v1397_v58, %v1680_v32  ;;  %v895_v54 = vsel %vm894_vm12, %v891_v26, %v893_v41  ;;  %v899_v55 = vsel %vm894_vm12, %v893_v41, %v891_v26 }
 0x192   : > { %v865_v51 = vadd.f32 %v863_v23, %v832_v16  ;;  %v866_v2 = vadd.f32 %v864_v24, %v833_v17  ;;  %v914_v49 = vmul.f32 %v910_v50, %v899_v55  ;;  %v1403_v16 = vld [vmem:[%s2049_s5 + $0x22] ss:$8 sm:$0x3]  ;;  %v1005_v17 = vrot.slane %v1401_v56, %v1678_v31  ;;  %v1404_v24 = vld [vmem:[%s2049_s5 + $0x23] ss:$8 sm:$0x3] }
 0x193   : > { %v880_v43 = vmul.f32 %v873_v39, %v1695_v45  ;;  %v881_v44 = vmul.f32 %v877_v40, %v1697_v46  ;;  %v1071_v23 = vrot.slane %v1403_v16, %v1678_v31 }
 0x194   : > { %v926_v27 = vpop.permute.xlu1 %925 }
 0x195   : > { %v886_v45 = vmul.f32 %v1760_v59, %v880_v43  ;;  %v887_v46 = vmul.f32 %v1760_v59, %v881_v44  ;;  %v913_v59 = vmul.f32 %v906_v48, %v895_v54  ;;  %v928_v14 = vsel %vm927_vm13, %v924_v3, %v926_v27  ;;  %v1405_v43 = vld [vmem:[%s2049_s5 + $0x24] ss:$8 sm:$0x3] }
 0x196   : > { %v932_v15 = vsel %vm927_vm13, %v926_v27, %v924_v3  ;;  %v946_v21 = vmul.f32 %v939_v62, %v928_v14  ;;  %v1075_v44 = vrot.slane %v1403_v16, %v1680_v32  ;;  %v1137_v54 = vrot.slane %v1405_v43, %v1678_v31 }
 0x197   : > { %v947_v22 = vmul.f32 %v943_v8, %v932_v15  ;;  %v888_v27 = vadd.f32 %v886_v45, %v865_v51  ;;  %v889_v58 = vadd.f32 %v887_v46, %v866_v2  ;;  %v919_v39 = vmul.f32 %v1785_v5, %v913_v59 }
 0x198   : > { %v957_v28 = vpop.permute.xlu1 %956  ;;  %v1104_v51 = vrot.slane %v1404_v24, %v1678_v31  ;;  %v1108_v2 = vrot.slane %v1404_v24, %v1680_v32  ;;  %v1181_v24 = vpop.permute.xlu0 %1180 }
 0x199   : > { %v953_v34 = vmul.f32 %v1791_v7, %v947_v22  ;;  %v921_v55 = vadd.f32 %v919_v39, %v888_v27 }
 0x19c   : > { %v959_v29 = vpop.permute.xlu1 %958 }
 0x19d   : > { %v961_v18 = vsel %vm960_vm14, %v957_v28, %v959_v29  ;;  %v965_v19 = vsel %vm960_vm14, %v959_v29, %v957_v28  ;;  %v920_v28 = vmul.f32 %v1785_v5, %v914_v49  ;;  %v952_v5 = vmul.f32 %v1791_v7, %v946_v21 }
 0x19e   : > { %v979_v29 = vmul.f32 %v972_v10, %v961_v18  ;;  %v980_v40 = vmul.f32 %v976_v11, %v965_v19  ;;  %v1141_v11 = vrot.slane %v1405_v43, %v1680_v32 }
 0x19f   : > { %v922_v45 = vadd.f32 %v920_v28, %v889_v58  ;;  %v954_v8 = vadd.f32 %v952_v5, %v921_v55  ;;  %v1214_v5 = vpop.permute.xlu0 %1213 }
 0x1a0   : > { %v1892_v30 = vpop.permute.xlu1 %989  ;;  %v985_v46 = vmul.f32 %v1763_v60, %v979_v29  ;;  %v986_v7 = vmul.f32 %v1763_v60, %v980_v40  ;;  %v1408_v40 = vld [vmem:[%s2049_s5 + $0x27] ss:$8 sm:$0x3] }
 0x1a1   : > { %v955_v10 = vadd.f32 %v953_v34, %v922_v45  ;;  %v1409_v45 = vld [vmem:[%s2049_s5 + $0x30] ss:$8 sm:$0x3] }
 0x1a4   : > { %v992_v33 = vpop.permute.xlu1 %991 }
 0x1a5   : > { %v994_v41 = vsel %vm993_vm15, %v1892_v30, %v992_v33  ;;  %v998_v42 = vsel %vm993_vm15, %v992_v33, %v1892_v30 }
 0x1a6   : > { %v1012_v50 = vmul.f32 %v1005_v17, %v994_v41  ;;  %v1013_v52 = vmul.f32 %v1009_v0, %v998_v42  ;;  %v1407_v17 = vld [vmem:[%s2049_s5 + $0x26] ss:$8 sm:$0x3]  ;;  %v987_v0 = vadd.f32 %v985_v46, %v954_v8 }
 0x1a7   : > { %v1203_v27 = vrot.slane %v1407_v17, %v1678_v31  ;;  %v1207_v29 = vrot.slane %v1407_v17, %v1680_v32 }
 0x1a8   : > { %v1894_v35 = vpop.permute.xlu1 %1022  ;;  %v1018_v12 = vmul.f32 %v1767_v61, %v1012_v50  ;;  %v1019_v59 = vmul.f32 %v1767_v61, %v1013_v52  ;;  %v988_v61 = vadd.f32 %v986_v7, %v955_v10  ;;  %v1240_v50 = vrot.slane %v1408_v40, %v1680_v32 }
 0x1aa   : > { %v1020_v22 = vadd.f32 %v1018_v12, %v987_v0 }
 0x1ac   : > { %v1896_v36 = vpop.permute.xlu1 %1024 }
 0x1ad   : > { %v1027_v48 = vsel %vm1026_vm0, %v1894_v35, %v1896_v36  ;;  %v1031_v30 = vsel %vm1026_vm0, %v1896_v36, %v1894_v35  ;;  %v1406_v36 = vld [vmem:[%s2049_s5 + $0x25] ss:$8 sm:$0x3] }
 0x1ae   : > { %v1045_v62 = vmul.f32 %v1038_v20, %v1027_v48  ;;  %v1046_v56 = vmul.f32 %v1042_v57, %v1031_v30  ;;  %v1170_v15 = vrot.slane %v1406_v36, %v1678_v31  ;;  %v1174_v16 = vrot.slane %v1406_v36, %v1680_v32  ;;  %v1247_v36 = vpop.permute.xlu0 %1246 }
 0x1af   : > { %v1236_v30 = vrot.slane %v1408_v40, %v1678_v31 }
 0x1b0   : > { %v1898_v37 = vpop.permute.xlu1 %1055  ;;  %v1051_v18 = vmul.f32 %v1772_v63, %v1045_v62  ;;  %v1052_v19 = vmul.f32 %v1772_v63, %v1046_v56 }
 0x1b2   : > { %v1053_v41 = vadd.f32 %v1051_v18, %v1020_v22  ;;  %v1280_v17 = vpop.permute.xlu0 %1279 }
 0x1b4   : > { %v1900_v9 = vpop.permute.xlu1 %1057 }
 0x1b5   : > { %v1060_v3 = vsel %vm1059_vm1, %v1898_v37, %v1900_v9  ;;  %v1064_v35 = vsel %vm1059_vm1, %v1900_v9, %v1898_v37 }
 0x1b6   : > { %v1078_v9 = vmul.f32 %v1071_v23, %v1060_v3  ;;  %v1079_v14 = vmul.f32 %v1075_v44, %v1064_v35  ;;  %v1021_v23 = vadd.f32 %v1019_v59, %v988_v61 }
 0x1b8   : > { %v1902_v38 = vpop.permute.xlu1 %1088  ;;  %v1084_v58 = vmul.f32 %v1777_v1, %v1078_v9  ;;  %v1085_v63 = vmul.f32 %v1777_v1, %v1079_v14  ;;  %v1054_v42 = vadd.f32 %v1052_v19, %v1021_v23  ;;  %v1290_v23 = vpop.permute.xlu0 %1289 }
 0x1ba   : > { %v1086_v34 = vadd.f32 %v1084_v58, %v1053_v41  ;;  %v1087_v48 = vadd.f32 %v1085_v63, %v1054_v42 }
 0x1bc   : > { %v1907_v25 = vpop.permute.xlu1 %1090 }
 0x1bd   : > { %v1093_v49 = vsel %vm1092_vm2, %v1902_v38, %v1907_v25  ;;  %v1097_v37 = vsel %vm1092_vm2, %v1907_v25, %v1902_v38 }
 0x1be   : > { %v1111_v20 = vmul.f32 %v1104_v51, %v1093_v49  ;;  %v1112_v57 = vmul.f32 %v1108_v2, %v1097_v37 }
 0x1c0   : > { %v1911_v53 = vpop.permute.xlu1 %1121  ;;  %v1117_v1 = vmul.f32 %v1783_v4, %v1111_v20  ;;  %v1118_v43 = vmul.f32 %v1783_v4, %v1112_v57 }
 0x1c2   : > { %v1119_v62 = vadd.f32 %v1117_v1, %v1086_v34  ;;  %v1120_v56 = vadd.f32 %v1118_v43, %v1087_v48 }
 0x1c4   : > { %v1921_v47 = vpop.permute.xlu1 %1123 }
 0x1c5   : > { %v1126_v38 = vsel %vm1125_vm3, %v1911_v53, %v1921_v47  ;;  %v1130_v25 = vsel %vm1125_vm3, %v1921_v47, %v1911_v53 }
 0x1c6   : > { %v1144_v53 = vmul.f32 %v1137_v54, %v1126_v38  ;;  %v1145_v47 = vmul.f32 %v1141_v11, %v1130_v25  ;;  %v1273_v11 = vrot.slane %v1409_v45, %v1680_v32 }
 0x1c8   : > { %v1940_v13 = vpop.permute.xlu1 %1154  ;;  %v1150_v52 = vmul.f32 %v1788_v6, %v1144_v53  ;;  %v1151_v54 = vmul.f32 %v1788_v6, %v1145_v47  ;;  %v1269_v6 = vrot.slane %v1409_v45, %v1678_v31 }
 0x1ca   : > { %v1152_v12 = vadd.f32 %v1150_v52, %v1119_v62 }
 0x1cc   : > { %v1953_v26 = vpop.permute.xlu1 %1156 }
 0x1cd   : > { %v1159_v39 = vsel %vm1158_vm4, %v1940_v13, %v1953_v26  ;;  %v1163_v28 = vsel %vm1158_vm4, %v1953_v26, %v1940_v13 }
 0x1ce   : > { %v1177_v51 = vmul.f32 %v1170_v15, %v1159_v39  ;;  %v1178_v2 = vmul.f32 %v1174_v16, %v1163_v28 }
 0x1d0   : > { %v1188_v33 = vpop.permute.xlu1 %1187  ;;  %v1183_v3 = vmul.f32 %v1181_v24, %v1177_v51  ;;  %v1184_v35 = vmul.f32 %v1181_v24, %v1178_v2 }
 0x1d2   : > { %v1185_v9 = vadd.f32 %v1183_v3, %v1152_v12 }
 0x1d4   : > { %v1190_v60 = vpop.permute.xlu1 %1189 }
 0x1d5   : > { %v1192_v13 = vsel %vm1191_vm5, %v1188_v33, %v1190_v60  ;;  %v1196_v26 = vsel %vm1191_vm5, %v1190_v60, %v1188_v33  ;;  %v1153_v60 = vadd.f32 %v1151_v54, %v1120_v56 }
 0x1d6   : > { %v1210_v33 = vmul.f32 %v1203_v27, %v1192_v13  ;;  %v1211_v46 = vmul.f32 %v1207_v29, %v1196_v26 }
 0x1d7   : > { %v1186_v14 = vadd.f32 %v1184_v35, %v1153_v60 }
 0x1d8   : > { %v1221_v21 = vpop.permute.xlu1 %1220  ;;  %v1216_v59 = vmul.f32 %v1214_v5, %v1210_v33  ;;  %v1217_v49 = vmul.f32 %v1214_v5, %v1211_v46 }
 0x1da   : > { %v1218_v20 = vadd.f32 %v1216_v59, %v1185_v9  ;;  %v1219_v31 = vadd.f32 %v1217_v49, %v1186_v14 }
 0x1dc   : > { %v1223_v44 = vpop.permute.xlu1 %1222 }
 0x1dd   : > { %v1225_v4 = vsel %vm1224_vm6, %v1221_v21, %v1223_v44  ;;  %v1229_v55 = vsel %vm1224_vm6, %v1223_v44, %v1221_v21 }
 0x1de   : > { %v1243_v8 = vmul.f32 %v1236_v30, %v1225_v4  ;;  %v1244_v10 = vmul.f32 %v1240_v50, %v1229_v55 }
 0x1e0   : > { %v1254_v7 = vpop.permute.xlu1 %1253  ;;  %v1249_v0 = vmul.f32 %v1247_v36, %v1243_v8  ;;  %v1250_v61 = vmul.f32 %v1247_v36, %v1244_v10 }
 0x1e2   : > { %v1251_v38 = vadd.f32 %v1249_v0, %v1218_v20  ;;  %v1252_v25 = vadd.f32 %v1250_v61, %v1219_v31 }
 0x1e4   : > { %v1256_v37 = vpop.permute.xlu1 %1255 }
 0x1e5   : > { %v1258_v15 = vsel %vm1257_vm7, %v1254_v7, %v1256_v37  ;;  %v1262_v16 = vsel %vm1257_vm7, %v1256_v37, %v1254_v7 }
 0x1e6   : > { %v1276_v18 = vmul.f32 %v1269_v6, %v1258_v15  ;;  %v1277_v19 = vmul.f32 %v1273_v11, %v1262_v16 }
 0x1e8   : > { %v1282_v57 = vmul.f32 %v1280_v17, %v1276_v18  ;;  %v1283_v32 = vmul.f32 %v1280_v17, %v1277_v19 }
 0x1ea   : > { %v1285_v21 = vadd.f32 %v1283_v32, %v1252_v25  ;;  %v1284_v22 = vadd.f32 %v1282_v57, %v1251_v38 }
 0x1ec   : > { %v1292_v24 = vmul.f32 %v1290_v23, %v1284_v22  ;;  %v1293_v27 = vmul.f32 %v1290_v23, %v1285_v21 }
 0x1f1   : > { %v1298_v58 = vpop.permute.xlu1 %1297 }
 0x1f2   : > { %v1300_v63 = vadd.f32 %v1298_v58, %v1292_v24  ;;  %v1301_v39 = vadd.f32 %v1298_v58, %v1293_v27 }
 0x1f4   : > { %v1410_v28 = vmul.f32 -1.442695, %v1300_v63  ;;  %v1411_v53 = vmul.f32 -1.442695, %v1301_v39 }
 0x1f6   : > { %1515 = vpow2.f32 %v1410_v28 }
 0x1f7   : > { %1517 = vpow2.f32 %v1411_v53 }
 0x203   : > { %v1516_v47 = vpop.eup %1515 }
 0x204   : > { %v1518_v29 = vpop.eup %1517  ;;  %v1308_v40 = vadd.f32 1.0, %v1516_v47 }
 0x205   : > { %v1309_v41 = vadd.f32 1.0, %v1518_v29 }
 0x206   : > { %1519 = vrcp.f32 %v1308_v40 }
 0x207   : > { %1521 = vrcp.f32 %v1309_v41 }
 0x213   : > { %v1520_v42 = vpop.eup %1519 }
 0x214   : > { %v1522_v1 = vpop.eup %1521  ;;  %v1314_v43 = vmul.f32 %v1520_v42, %v1300_v63 }
 0x215   : > { %v1315_v44 = vmul.f32 %v1522_v1, %v1301_v39 }
 0x216   : > { %1318 = vst [vmem:[%s1693_s22 + $0x10] sm:$0xff] %v1314_v43 }
 0x217   : > { %1319 = vst [vmem:[%s1693_s22 + $0x18] sm:$0xff] %v1315_v44 }
 0x218 PF: > { %s18_s27 = sadd.s32 1, %s1529_s27  }
 0x219   : > { %p15_p4 = scmp.ge.s32.totalorder %s18_s27, 4  }
 0x21b   :  { %17 = sbr.rel (!%p15_p4) target bundleno = 1 (0x1), region = 106 }

</bundles_post_ra>
